<compile_context>
chip_gen: v5e
topology: v5e:2x2
jax: 0.10.0
libtpu: 0.0.40
codegen_flags: <defaults>
</compile_context>

<pallas_src>
import jax
import jax.numpy as jnp
import numpy as np
from jax.experimental import pallas as pl
from jax.experimental.pallas import tpu as pltpu


def _make_rdg_kernel(*, G0, G, n_c, n_rdb, H, W):
    HW = H * W

    def kernel(*refs):
        x_ref, alpha_ref, mvu_ref, mvd_ref, mhl_ref, mhr_ref = refs[:6]
        o_ref = refs[-1]
        w_refs = refs[6:-1]

        f32 = jnp.float32
        x = x_ref[...].astype(f32)                       # (G0, HW)

        # Border-validity masks, (1, HW) 0/1 floats, broadcast over channels.
        m_up = mvu_ref[...]      # source row h-1 is valid
        m_dn = mvd_ref[...]      # source row h+1 is valid
        m_lf = mhl_ref[...]      # source col w-1 is valid
        m_rt = mhr_ref[...]      # source col w+1 is valid

        widx = [0]

        def next_ref():
            r = w_refs[widx[0]]
            widx[0] += 1
            return r

        def conv3x3_prelu(cat, w9_ref, b_ref, alpha):
            """3x3 same-conv (+bias, PReLU): (Cin, HW) -> (Cout, HW)."""
            cout = w9_ref.shape[1]
            acc = jnp.zeros((cout, HW), f32)
            for dy in (-1, 0, 1):
                for dx in (-1, 0, 1):
                    d = dy * W + dx                      # flat-index offset
                    if d == 0:
                        sh = cat
                    else:
                        # sh[:, i] = cat[:, i + d]; wrapped values masked below.
                        sh = pltpu.roll(cat, (-d) % HW, axis=1)
                    if dy == -1:
                        sh = sh * m_up
                    elif dy == 1:
                        sh = sh * m_dn
                    if dx == -1:
                        sh = sh * m_lf
                    elif dx == 1:
                        sh = sh * m_rt
                    k = (dy + 1) * 3 + (dx + 1)
                    acc = acc + jnp.dot(w9_ref[k].astype(f32), sh,
                                        preferred_element_type=f32)
            acc = acc + b_ref[...].astype(f32)           # (Cout, 1) broadcast
            return jnp.where(acc >= 0.0, acc, alpha * acc)   # PReLU

        buffer = x
        rdb_outs = []
        for r in range(n_rdb):
            cat = buffer                                 # (G0, HW)
            for i in range(n_c):
                w9_ref = next_ref()
                b_ref = next_ref()
                alpha = alpha_ref[r * n_c + i]           # SMEM scalar
                out = conv3x3_prelu(cat, w9_ref, b_ref, alpha)   # (G, HW)
                cat = jnp.concatenate([cat, out], axis=0)        # channel concat
            lffw_ref = next_ref()
            lffb_ref = next_ref()
            lff = jnp.dot(lffw_ref[...].astype(f32), cat,
                          preferred_element_type=f32) + lffb_ref[...].astype(f32)
            buffer = lff + buffer                        # local residual
            rdb_outs.append(buffer)

        fw_ref = next_ref()
        fb_ref = next_ref()
        big = jnp.concatenate(rdb_outs, axis=0)          # (n_rdb*G0, HW)
        y = jnp.dot(fw_ref[...].astype(f32), big,
                    preferred_element_type=f32) + fb_ref[...].astype(f32)
        o_ref[...] = y.astype(o_ref.dtype)

    return kernel


def rdg_forward(x, params):
    """RDG forward pass. x: (B, G0, H, W) NCHW. Returns (B, G0, H, W)."""
    B, G0, H, W = x.shape
    HW = H * W
    rdbs = params["rdbs"]
    n_rdb = len(rdbs)
    n_c = len(rdbs[0]["convs"])
    G = rdbs[0]["convs"][0]["w"].shape[0]
    f32 = jnp.float32

    x_flat = x.reshape(B, G0, HW)

    # Trace-time 0/1 border masks for the 3x3 taps (row-major flattened H*W).
    h_idx = np.arange(HW) // W
    w_idx = np.arange(HW) % W
    m_up = jnp.asarray((h_idx >= 1).astype(np.float32).reshape(1, HW))
    m_dn = jnp.asarray((h_idx <= H - 2).astype(np.float32).reshape(1, HW))
    m_lf = jnp.asarray((w_idx >= 1).astype(np.float32).reshape(1, HW))
    m_rt = jnp.asarray((w_idx <= W - 2).astype(np.float32).reshape(1, HW))

    alphas = jnp.stack([jnp.asarray(cv["alpha"], f32)
                        for rdb in rdbs for cv in rdb["convs"]])   # (n_rdb*n_c,)

    def full_spec(a):
        nd = a.ndim
        return pl.BlockSpec(a.shape, lambda b, _n=nd: (0,) * _n)

    operands = [x_flat, alphas, m_up, m_dn, m_lf, m_rt]
    in_specs = [
        pl.BlockSpec((None, G0, HW), lambda b: (b, 0, 0)),          # per-batch x
        pl.BlockSpec(memory_space=pltpu.MemorySpace.SMEM),          # PReLU alphas
        full_spec(m_up), full_spec(m_dn), full_spec(m_lf), full_spec(m_rt),
    ]

    flops = 0
    for rdb in rdbs:
        for cv in rdb["convs"]:
            w = cv["w"].astype(f32)                                 # (G, Cin, 3, 3)
            cin = w.shape[1]
            w9 = jnp.transpose(w, (2, 3, 0, 1)).reshape(9, G, cin)  # tap-major
            bia = cv["b"].astype(f32).reshape(G, 1)
            operands += [w9, bia]
            in_specs += [full_spec(w9), full_spec(bia)]
            flops += 2 * 9 * HW * G * cin
        lffw = rdb["lff_w"].astype(f32).reshape(G0, G0 + n_c * G)
        lffb = rdb["lff_b"].astype(f32).reshape(G0, 1)
        operands += [lffw, lffb]
        in_specs += [full_spec(lffw), full_spec(lffb)]
        flops += 2 * HW * G0 * (G0 + n_c * G)
    fw = params["final_w"].astype(f32).reshape(G0, n_rdb * G0)
    fb = params["final_b"].astype(f32).reshape(G0, 1)
    operands += [fw, fb]
    in_specs += [full_spec(fw), full_spec(fb)]
    flops += 2 * HW * G0 * (n_rdb * G0)
    flops *= B

    bytes_accessed = int(
        sum(int(np.prod(o.shape)) * o.dtype.itemsize for o in operands)
        + B * G0 * HW * x.dtype.itemsize)

    kernel = _make_rdg_kernel(G0=G0, G=G, n_c=n_c, n_rdb=n_rdb, H=H, W=W)

    out_flat = pl.pallas_call(
        kernel,
        out_shape=jax.ShapeDtypeStruct((B, G0, HW), x.dtype),
        grid_spec=pltpu.PrefetchScalarGridSpec(
            num_scalar_prefetch=0,
            grid=(B,),
            in_specs=in_specs,
            out_specs=pl.BlockSpec((None, G0, HW), lambda b: (b, 0, 0)),
        ),
        compiler_params=pltpu.CompilerParams(
            dimension_semantics=("parallel",),
            vmem_limit_bytes=32 * 1024 * 1024,
        ),
        cost_estimate=pl.CostEstimate(flops=int(flops), transcendentals=0,
                                      bytes_accessed=bytes_accessed),
    )(*operands)

    return out_flat.reshape(B, G0, H, W)


def _init_params(key, G0, C, G, n_RDB):
    def nrm(k, shape, scale):
        return jax.random.normal(k, shape, jnp.float32) * scale

    params = {"rdbs": []}
    for _ in range(n_RDB):
        convs = []
        for i in range(C):
            cin = G0 + i * G
            key, kw, kb = jax.random.split(key, 3)
            convs.append({"w": nrm(kw, (G, cin, 3, 3), 0.1),
                          "b": nrm(kb, (G,), 0.05),
                          "alpha": jnp.float32(0.25)})   # nn.PReLU() default
        key, kw, kb = jax.random.split(key, 3)
        params["rdbs"].append({
            "convs": convs,
            "lff_w": nrm(kw, (G0, G0 + C * G, 1, 1), 0.1),
            "lff_b": nrm(kb, (G0,), 0.05),
        })
    key, kw, kb = jax.random.split(key, 3)
    params["final_w"] = nrm(kw, (G0, n_RDB * G0, 1, 1), 0.1)
    params["final_b"] = nrm(kb, (G0,), 0.05)
    return params


def _reference(x, params):
    """Pure-JAX (XLA conv) replica of the PyTorch RDG forward."""
    hi = jax.lax.Precision.HIGHEST

    def conv(x, w, b, pad):
        y = jax.lax.conv_general_dilated(
            x, w, window_strides=(1, 1), padding=((pad, pad), (pad, pad)),
            dimension_numbers=("NCHW", "OIHW", "NCHW"), precision=hi)
        return y + b[None, :, None, None]

    buffer = x
    temp = []
    for rdb in params["rdbs"]:
        cat = buffer
        for cv in rdb["convs"]:
            y = conv(cat, cv["w"], cv["b"], 1)
            y = jnp.where(y >= 0.0, y, cv["alpha"] * y)          # PReLU
            cat = jnp.concatenate([cat, y], axis=1)
        lff = conv(cat, rdb["lff_w"], rdb["lff_b"], 0)
        buffer = lff + buffer
        temp.append(buffer)
    big = jnp.concatenate(temp, axis=1)
    return conv(big, params["final_w"], params["final_b"], 0)


if __name__ == "__main__":
    # RDG(G0=16, C=2, G=8, n_RDB=2) on a (2, 16, 16, 16) NCHW input.
    B, G0, C, G, n_RDB, H, W = 2, 16, 2, 8, 2, 16, 16

    key = jax.random.PRNGKey(0)
    key, kx = jax.random.split(key)
    x = jax.random.normal(kx, (B, G0, H, W), jnp.float32)
    params = _init_params(key, G0, C, G, n_RDB)

    out = rdg_forward(x, params)
    out = jax.block_until_ready(out)

    ref = _reference(x, params)
    assert out.shape == (B, G0, H, W)
    assert jnp.allclose(out, ref, atol=1e-3, rtol=1e-3), (
        "mismatch vs reference: max abs err = "
        f"{float(jnp.max(jnp.abs(out - ref)))}")
    print("KERNEL_OK")
</pallas_src>

<mosaic_0001>
module attributes {stable_mosaic.version = 11 : i64} {
  func.func @kernel(%arg0: i32, %arg1: memref<1x16x256xf32, #tpu.memory_space<vmem>>, %arg2: memref<4xf32, #tpu.memory_space<smem>>, %arg3: memref<1x256xf32, #tpu.memory_space<vmem>>, %arg4: memref<1x256xf32, #tpu.memory_space<vmem>>, %arg5: memref<1x256xf32, #tpu.memory_space<vmem>>, %arg6: memref<1x256xf32, #tpu.memory_space<vmem>>, %arg7: memref<9x8x16xf32, #tpu.memory_space<vmem>>, %arg8: memref<8x1xf32, #tpu.memory_space<vmem>>, %arg9: memref<9x8x24xf32, #tpu.memory_space<vmem>>, %arg10: memref<8x1xf32, #tpu.memory_space<vmem>>, %arg11: memref<16x32xf32, #tpu.memory_space<vmem>>, %arg12: memref<16x1xf32, #tpu.memory_space<vmem>>, %arg13: memref<9x8x16xf32, #tpu.memory_space<vmem>>, %arg14: memref<8x1xf32, #tpu.memory_space<vmem>>, %arg15: memref<9x8x24xf32, #tpu.memory_space<vmem>>, %arg16: memref<8x1xf32, #tpu.memory_space<vmem>>, %arg17: memref<16x32xf32, #tpu.memory_space<vmem>>, %arg18: memref<16x1xf32, #tpu.memory_space<vmem>>, %arg19: memref<16x32xf32, #tpu.memory_space<vmem>>, %arg20: memref<16x1xf32, #tpu.memory_space<vmem>>, %arg21: memref<1x16x256xf32, #tpu.memory_space<vmem>>) attributes {dimension_semantics = [#tpu.dimension_semantics<parallel>], iteration_bounds = array<i64: 2>, scalar_prefetch = 0 : i64, scratch_operands = 0 : i64, tpu.core_type = #tpu.core_type<tc>, window_params = [{transform_indices = @transform_0, window_bounds = array<i64: 1, 16, 256>}, {transform_indices = @transform_1, window_bounds = array<i64: 4>}, {pipeline_mode = #tpu.pipeline_mode<synchronous>, transform_indices = @transform_2, window_bounds = array<i64: 1, 256>}, {pipeline_mode = #tpu.pipeline_mode<synchronous>, transform_indices = @transform_3, window_bounds = array<i64: 1, 256>}, {pipeline_mode = #tpu.pipeline_mode<synchronous>, transform_indices = @transform_4, window_bounds = array<i64: 1, 256>}, {pipeline_mode = #tpu.pipeline_mode<synchronous>, transform_indices = @transform_5, window_bounds = array<i64: 1, 256>}, {pipeline_mode = #tpu.pipeline_mode<synchronous>, transform_indices = @transform_6, window_bounds = array<i64: 9, 8, 16>}, {pipeline_mode = #tpu.pipeline_mode<synchronous>, transform_indices = @transform_7, window_bounds = array<i64: 8, 1>}, {pipeline_mode = #tpu.pipeline_mode<synchronous>, transform_indices = @transform_8, window_bounds = array<i64: 9, 8, 24>}, {pipeline_mode = #tpu.pipeline_mode<synchronous>, transform_indices = @transform_9, window_bounds = array<i64: 8, 1>}, {pipeline_mode = #tpu.pipeline_mode<synchronous>, transform_indices = @transform_10, window_bounds = array<i64: 16, 32>}, {pipeline_mode = #tpu.pipeline_mode<synchronous>, transform_indices = @transform_11, window_bounds = array<i64: 16, 1>}, {pipeline_mode = #tpu.pipeline_mode<synchronous>, transform_indices = @transform_12, window_bounds = array<i64: 9, 8, 16>}, {pipeline_mode = #tpu.pipeline_mode<synchronous>, transform_indices = @transform_13, window_bounds = array<i64: 8, 1>}, {pipeline_mode = #tpu.pipeline_mode<synchronous>, transform_indices = @transform_14, window_bounds = array<i64: 9, 8, 24>}, {pipeline_mode = #tpu.pipeline_mode<synchronous>, transform_indices = @transform_15, window_bounds = array<i64: 8, 1>}, {pipeline_mode = #tpu.pipeline_mode<synchronous>, transform_indices = @transform_16, window_bounds = array<i64: 16, 32>}, {pipeline_mode = #tpu.pipeline_mode<synchronous>, transform_indices = @transform_17, window_bounds = array<i64: 16, 1>}, {pipeline_mode = #tpu.pipeline_mode<synchronous>, transform_indices = @transform_18, window_bounds = array<i64: 16, 32>}, {pipeline_mode = #tpu.pipeline_mode<synchronous>, transform_indices = @transform_19, window_bounds = array<i64: 16, 1>}, {transform_indices = @transform_20, window_bounds = array<i64: 1, 16, 256>}]} {
    %c0 = arith.constant 0 : index
    %c0_0 = arith.constant 0 : index
    %c0_1 = arith.constant 0 : index
    %0 = vector.load %arg1[%c0, %c0_0, %c0_1] : memref<1x16x256xf32, #tpu.memory_space<vmem>>, vector<1x16x256xf32>
    %1 = vector.shape_cast %0 : vector<1x16x256xf32> to vector<16x256xf32>
    %c0_2 = arith.constant 0 : index
    %c0_3 = arith.constant 0 : index
    %2 = vector.load %arg3[%c0_2, %c0_3] : memref<1x256xf32, #tpu.memory_space<vmem>>, vector<1x256xf32>
    %c0_4 = arith.constant 0 : index
    %c0_5 = arith.constant 0 : index
    %3 = vector.load %arg4[%c0_4, %c0_5] : memref<1x256xf32, #tpu.memory_space<vmem>>, vector<1x256xf32>
    %c0_6 = arith.constant 0 : index
    %c0_7 = arith.constant 0 : index
    %4 = vector.load %arg5[%c0_6, %c0_7] : memref<1x256xf32, #tpu.memory_space<vmem>>, vector<1x256xf32>
    %c0_8 = arith.constant 0 : index
    %c0_9 = arith.constant 0 : index
    %5 = vector.load %arg6[%c0_8, %c0_9] : memref<1x256xf32, #tpu.memory_space<vmem>>, vector<1x256xf32>
    %c0_10 = arith.constant 0 : index
    %6 = memref.load %arg2[%c0_10] : memref<4xf32, #tpu.memory_space<smem>>
    %cst = arith.constant 0.000000e+00 : f32
    %7 = vector.broadcast %cst : f32 to vector<8x256xf32>
    %c17_i32 = arith.constant 17 : i32
    %8 = tpu.dynamic_rotate %1 by %c17_i32 dim 1 : vector<16x256xf32>, i32 -> vector<16x256xf32>
    %9 = vector.broadcast %2 : vector<1x256xf32> to vector<16x256xf32>
    %10 = arith.mulf %8, %9 : vector<16x256xf32>
    %11 = vector.broadcast %4 : vector<1x256xf32> to vector<16x256xf32>
    %12 = arith.mulf %10, %11 : vector<16x256xf32>
    %c0_11 = arith.constant 0 : index
    %c0_12 = arith.constant 0 : index
    %c0_13 = arith.constant 0 : index
    %13 = vector.load %arg7[%c0_11, %c0_12, %c0_13] : memref<9x8x16xf32, #tpu.memory_space<vmem>>, vector<1x8x16xf32>
    %14 = vector.shape_cast %13 : vector<1x8x16xf32> to vector<8x16xf32>
    %cst_14 = arith.constant dense<0.000000e+00> : vector<8x256xf32>
    %15 = tpu.matmul %14, %12, %cst_14 {dimension_numbers = #tpu.dot_dimension_numbers<[1], [0], [0], [1], [0, 0, 1, 1], [], []>} : vector<8x16xf32>, vector<16x256xf32>, vector<8x256xf32> -> vector<8x256xf32>
    %16 = arith.addf %7, %15 : vector<8x256xf32>
    %c16_i32 = arith.constant 16 : i32
    %17 = tpu.dynamic_rotate %1 by %c16_i32 dim 1 : vector<16x256xf32>, i32 -> vector<16x256xf32>
    %18 = vector.broadcast %2 : vector<1x256xf32> to vector<16x256xf32>
    %19 = arith.mulf %17, %18 : vector<16x256xf32>
    %c1 = arith.constant 1 : index
    %c0_15 = arith.constant 0 : index
    %c0_16 = arith.constant 0 : index
    %20 = vector.load %arg7[%c1, %c0_15, %c0_16] : memref<9x8x16xf32, #tpu.memory_space<vmem>>, vector<1x8x16xf32>
    %21 = vector.shape_cast %20 : vector<1x8x16xf32> to vector<8x16xf32>
    %cst_17 = arith.constant dense<0.000000e+00> : vector<8x256xf32>
    %22 = tpu.matmul %21, %19, %cst_17 {dimension_numbers = #tpu.dot_dimension_numbers<[1], [0], [0], [1], [0, 0, 1, 1], [], []>} : vector<8x16xf32>, vector<16x256xf32>, vector<8x256xf32> -> vector<8x256xf32>
    %23 = arith.addf %16, %22 : vector<8x256xf32>
    %c15_i32 = arith.constant 15 : i32
    %24 = tpu.dynamic_rotate %1 by %c15_i32 dim 1 : vector<16x256xf32>, i32 -> vector<16x256xf32>
    %25 = vector.broadcast %2 : vector<1x256xf32> to vector<16x256xf32>
    %26 = arith.mulf %24, %25 : vector<16x256xf32>
    %27 = vector.broadcast %5 : vector<1x256xf32> to vector<16x256xf32>
    %28 = arith.mulf %26, %27 : vector<16x256xf32>
    %c2 = arith.constant 2 : index
    %c0_18 = arith.constant 0 : index
    %c0_19 = arith.constant 0 : index
    %29 = vector.load %arg7[%c2, %c0_18, %c0_19] : memref<9x8x16xf32, #tpu.memory_space<vmem>>, vector<1x8x16xf32>
    %30 = vector.shape_cast %29 : vector<1x8x16xf32> to vector<8x16xf32>
    %cst_20 = arith.constant dense<0.000000e+00> : vector<8x256xf32>
    %31 = tpu.matmul %30, %28, %cst_20 {dimension_numbers = #tpu.dot_dimension_numbers<[1], [0], [0], [1], [0, 0, 1, 1], [], []>} : vector<8x16xf32>, vector<16x256xf32>, vector<8x256xf32> -> vector<8x256xf32>
    %32 = arith.addf %23, %31 : vector<8x256xf32>
    %c1_i32 = arith.constant 1 : i32
    %33 = tpu.dynamic_rotate %1 by %c1_i32 dim 1 : vector<16x256xf32>, i32 -> vector<16x256xf32>
    %34 = vector.broadcast %4 : vector<1x256xf32> to vector<16x256xf32>
    %35 = arith.mulf %33, %34 : vector<16x256xf32>
    %c3 = arith.constant 3 : index
    %c0_21 = arith.constant 0 : index
    %c0_22 = arith.constant 0 : index
    %36 = vector.load %arg7[%c3, %c0_21, %c0_22] : memref<9x8x16xf32, #tpu.memory_space<vmem>>, vector<1x8x16xf32>
    %37 = vector.shape_cast %36 : vector<1x8x16xf32> to vector<8x16xf32>
    %cst_23 = arith.constant dense<0.000000e+00> : vector<8x256xf32>
    %38 = tpu.matmul %37, %35, %cst_23 {dimension_numbers = #tpu.dot_dimension_numbers<[1], [0], [0], [1], [0, 0, 1, 1], [], []>} : vector<8x16xf32>, vector<16x256xf32>, vector<8x256xf32> -> vector<8x256xf32>
    %39 = arith.addf %32, %38 : vector<8x256xf32>
    %c4 = arith.constant 4 : index
    %c0_24 = arith.constant 0 : index
    %c0_25 = arith.constant 0 : index
    %40 = vector.load %arg7[%c4, %c0_24, %c0_25] : memref<9x8x16xf32, #tpu.memory_space<vmem>>, vector<1x8x16xf32>
    %41 = vector.shape_cast %40 : vector<1x8x16xf32> to vector<8x16xf32>
    %cst_26 = arith.constant dense<0.000000e+00> : vector<8x256xf32>
    %42 = tpu.matmul %41, %1, %cst_26 {dimension_numbers = #tpu.dot_dimension_numbers<[1], [0], [0], [1], [0, 0, 1, 1], [], []>} : vector<8x16xf32>, vector<16x256xf32>, vector<8x256xf32> -> vector<8x256xf32>
    %43 = arith.addf %39, %42 : vector<8x256xf32>
    %c255_i32 = arith.constant 255 : i32
    %44 = tpu.dynamic_rotate %1 by %c255_i32 dim 1 : vector<16x256xf32>, i32 -> vector<16x256xf32>
    %45 = vector.broadcast %5 : vector<1x256xf32> to vector<16x256xf32>
    %46 = arith.mulf %44, %45 : vector<16x256xf32>
    %c5 = arith.constant 5 : index
    %c0_27 = arith.constant 0 : index
    %c0_28 = arith.constant 0 : index
    %47 = vector.load %arg7[%c5, %c0_27, %c0_28] : memref<9x8x16xf32, #tpu.memory_space<vmem>>, vector<1x8x16xf32>
    %48 = vector.shape_cast %47 : vector<1x8x16xf32> to vector<8x16xf32>
    %cst_29 = arith.constant dense<0.000000e+00> : vector<8x256xf32>
    %49 = tpu.matmul %48, %46, %cst_29 {dimension_numbers = #tpu.dot_dimension_numbers<[1], [0], [0], [1], [0, 0, 1, 1], [], []>} : vector<8x16xf32>, vector<16x256xf32>, vector<8x256xf32> -> vector<8x256xf32>
    %50 = arith.addf %43, %49 : vector<8x256xf32>
    %c241_i32 = arith.constant 241 : i32
    %51 = tpu.dynamic_rotate %1 by %c241_i32 dim 1 : vector<16x256xf32>, i32 -> vector<16x256xf32>
    %52 = vector.broadcast %3 : vector<1x256xf32> to vector<16x256xf32>
    %53 = arith.mulf %51, %52 : vector<16x256xf32>
    %54 = vector.broadcast %4 : vector<1x256xf32> to vector<16x256xf32>
    %55 = arith.mulf %53, %54 : vector<16x256xf32>
    %c6 = arith.constant 6 : index
    %c0_30 = arith.constant 0 : index
    %c0_31 = arith.constant 0 : index
    %56 = vector.load %arg7[%c6, %c0_30, %c0_31] : memref<9x8x16xf32, #tpu.memory_space<vmem>>, vector<1x8x16xf32>
    %57 = vector.shape_cast %56 : vector<1x8x16xf32> to vector<8x16xf32>
    %cst_32 = arith.constant dense<0.000000e+00> : vector<8x256xf32>
    %58 = tpu.matmul %57, %55, %cst_32 {dimension_numbers = #tpu.dot_dimension_numbers<[1], [0], [0], [1], [0, 0, 1, 1], [], []>} : vector<8x16xf32>, vector<16x256xf32>, vector<8x256xf32> -> vector<8x256xf32>
    %59 = arith.addf %50, %58 : vector<8x256xf32>
    %c240_i32 = arith.constant 240 : i32
    %60 = tpu.dynamic_rotate %1 by %c240_i32 dim 1 : vector<16x256xf32>, i32 -> vector<16x256xf32>
    %61 = vector.broadcast %3 : vector<1x256xf32> to vector<16x256xf32>
    %62 = arith.mulf %60, %61 : vector<16x256xf32>
    %c7 = arith.constant 7 : index
    %c0_33 = arith.constant 0 : index
    %c0_34 = arith.constant 0 : index
    %63 = vector.load %arg7[%c7, %c0_33, %c0_34] : memref<9x8x16xf32, #tpu.memory_space<vmem>>, vector<1x8x16xf32>
    %64 = vector.shape_cast %63 : vector<1x8x16xf32> to vector<8x16xf32>
    %cst_35 = arith.constant dense<0.000000e+00> : vector<8x256xf32>
    %65 = tpu.matmul %64, %62, %cst_35 {dimension_numbers = #tpu.dot_dimension_numbers<[1], [0], [0], [1], [0, 0, 1, 1], [], []>} : vector<8x16xf32>, vector<16x256xf32>, vector<8x256xf32> -> vector<8x256xf32>
    %66 = arith.addf %59, %65 : vector<8x256xf32>
    %c239_i32 = arith.constant 239 : i32
    %67 = tpu.dynamic_rotate %1 by %c239_i32 dim 1 : vector<16x256xf32>, i32 -> vector<16x256xf32>
    %68 = vector.broadcast %3 : vector<1x256xf32> to vector<16x256xf32>
    %69 = arith.mulf %67, %68 : vector<16x256xf32>
    %70 = vector.broadcast %5 : vector<1x256xf32> to vector<16x256xf32>
    %71 = arith.mulf %69, %70 : vector<16x256xf32>
    %c8 = arith.constant 8 : index
    %c0_36 = arith.constant 0 : index
    %c0_37 = arith.constant 0 : index
    %72 = vector.load %arg7[%c8, %c0_36, %c0_37] : memref<9x8x16xf32, #tpu.memory_space<vmem>>, vector<1x8x16xf32>
    %73 = vector.shape_cast %72 : vector<1x8x16xf32> to vector<8x16xf32>
    %cst_38 = arith.constant dense<0.000000e+00> : vector<8x256xf32>
    %74 = tpu.matmul %73, %71, %cst_38 {dimension_numbers = #tpu.dot_dimension_numbers<[1], [0], [0], [1], [0, 0, 1, 1], [], []>} : vector<8x16xf32>, vector<16x256xf32>, vector<8x256xf32> -> vector<8x256xf32>
    %75 = arith.addf %66, %74 : vector<8x256xf32>
    %c0_39 = arith.constant 0 : index
    %c0_40 = arith.constant 0 : index
    %76 = vector.load %arg8[%c0_39, %c0_40] : memref<8x1xf32, #tpu.memory_space<vmem>>, vector<8x1xf32>
    %77 = vector.broadcast %76 : vector<8x1xf32> to vector<8x256xf32>
    %78 = arith.addf %75, %77 : vector<8x256xf32>
    %cst_41 = arith.constant 0.000000e+00 : f32
    %79 = vector.broadcast %cst_41 : f32 to vector<8x256xf32>
    %80 = arith.cmpf oge, %78, %79 : vector<8x256xf32>
    %81 = vector.broadcast %6 : f32 to vector<8x256xf32>
    %82 = arith.mulf %81, %78 : vector<8x256xf32>
    %83 = arith.select %80, %78, %82 : vector<8x256xi1>, vector<8x256xf32>
    %84 = tpu.concatenate %1, %83 in 0 : vector<16x256xf32>, vector<8x256xf32> -> vector<24x256xf32>
    %c1_42 = arith.constant 1 : index
    %85 = memref.load %arg2[%c1_42] : memref<4xf32, #tpu.memory_space<smem>>
    %cst_43 = arith.constant 0.000000e+00 : f32
    %86 = vector.broadcast %cst_43 : f32 to vector<8x256xf32>
    %c17_i32_44 = arith.constant 17 : i32
    %87 = tpu.dynamic_rotate %84 by %c17_i32_44 dim 1 : vector<24x256xf32>, i32 -> vector<24x256xf32>
    %88 = vector.broadcast %2 : vector<1x256xf32> to vector<24x256xf32>
    %89 = arith.mulf %87, %88 : vector<24x256xf32>
    %90 = vector.broadcast %4 : vector<1x256xf32> to vector<24x256xf32>
    %91 = arith.mulf %89, %90 : vector<24x256xf32>
    %c0_45 = arith.constant 0 : index
    %c0_46 = arith.constant 0 : index
    %c0_47 = arith.constant 0 : index
    %92 = vector.load %arg9[%c0_45, %c0_46, %c0_47] : memref<9x8x24xf32, #tpu.memory_space<vmem>>, vector<1x8x24xf32>
    %93 = vector.shape_cast %92 : vector<1x8x24xf32> to vector<8x24xf32>
    %cst_48 = arith.constant dense<0.000000e+00> : vector<8x256xf32>
    %94 = tpu.matmul %93, %91, %cst_48 {dimension_numbers = #tpu.dot_dimension_numbers<[1], [0], [0], [1], [0, 0, 1, 1], [], []>} : vector<8x24xf32>, vector<24x256xf32>, vector<8x256xf32> -> vector<8x256xf32>
    %95 = arith.addf %86, %94 : vector<8x256xf32>
    %c16_i32_49 = arith.constant 16 : i32
    %96 = tpu.dynamic_rotate %84 by %c16_i32_49 dim 1 : vector<24x256xf32>, i32 -> vector<24x256xf32>
    %97 = vector.broadcast %2 : vector<1x256xf32> to vector<24x256xf32>
    %98 = arith.mulf %96, %97 : vector<24x256xf32>
    %c1_50 = arith.constant 1 : index
    %c0_51 = arith.constant 0 : index
    %c0_52 = arith.constant 0 : index
    %99 = vector.load %arg9[%c1_50, %c0_51, %c0_52] : memref<9x8x24xf32, #tpu.memory_space<vmem>>, vector<1x8x24xf32>
    %100 = vector.shape_cast %99 : vector<1x8x24xf32> to vector<8x24xf32>
    %cst_53 = arith.constant dense<0.000000e+00> : vector<8x256xf32>
    %101 = tpu.matmul %100, %98, %cst_53 {dimension_numbers = #tpu.dot_dimension_numbers<[1], [0], [0], [1], [0, 0, 1, 1], [], []>} : vector<8x24xf32>, vector<24x256xf32>, vector<8x256xf32> -> vector<8x256xf32>
    %102 = arith.addf %95, %101 : vector<8x256xf32>
    %c15_i32_54 = arith.constant 15 : i32
    %103 = tpu.dynamic_rotate %84 by %c15_i32_54 dim 1 : vector<24x256xf32>, i32 -> vector<24x256xf32>
    %104 = vector.broadcast %2 : vector<1x256xf32> to vector<24x256xf32>
    %105 = arith.mulf %103, %104 : vector<24x256xf32>
    %106 = vector.broadcast %5 : vector<1x256xf32> to vector<24x256xf32>
    %107 = arith.mulf %105, %106 : vector<24x256xf32>
    %c2_55 = arith.constant 2 : index
    %c0_56 = arith.constant 0 : index
    %c0_57 = arith.constant 0 : index
    %108 = vector.load %arg9[%c2_55, %c0_56, %c0_57] : memref<9x8x24xf32, #tpu.memory_space<vmem>>, vector<1x8x24xf32>
    %109 = vector.shape_cast %108 : vector<1x8x24xf32> to vector<8x24xf32>
    %cst_58 = arith.constant dense<0.000000e+00> : vector<8x256xf32>
    %110 = tpu.matmul %109, %107, %cst_58 {dimension_numbers = #tpu.dot_dimension_numbers<[1], [0], [0], [1], [0, 0, 1, 1], [], []>} : vector<8x24xf32>, vector<24x256xf32>, vector<8x256xf32> -> vector<8x256xf32>
    %111 = arith.addf %102, %110 : vector<8x256xf32>
    %c1_i32_59 = arith.constant 1 : i32
    %112 = tpu.dynamic_rotate %84 by %c1_i32_59 dim 1 : vector<24x256xf32>, i32 -> vector<24x256xf32>
    %113 = vector.broadcast %4 : vector<1x256xf32> to vector<24x256xf32>
    %114 = arith.mulf %112, %113 : vector<24x256xf32>
    %c3_60 = arith.constant 3 : index
    %c0_61 = arith.constant 0 : index
    %c0_62 = arith.constant 0 : index
    %115 = vector.load %arg9[%c3_60, %c0_61, %c0_62] : memref<9x8x24xf32, #tpu.memory_space<vmem>>, vector<1x8x24xf32>
    %116 = vector.shape_cast %115 : vector<1x8x24xf32> to vector<8x24xf32>
    %cst_63 = arith.constant dense<0.000000e+00> : vector<8x256xf32>
    %117 = tpu.matmul %116, %114, %cst_63 {dimension_numbers = #tpu.dot_dimension_numbers<[1], [0], [0], [1], [0, 0, 1, 1], [], []>} : vector<8x24xf32>, vector<24x256xf32>, vector<8x256xf32> -> vector<8x256xf32>
    %118 = arith.addf %111, %117 : vector<8x256xf32>
    %c4_64 = arith.constant 4 : index
    %c0_65 = arith.constant 0 : index
    %c0_66 = arith.constant 0 : index
    %119 = vector.load %arg9[%c4_64, %c0_65, %c0_66] : memref<9x8x24xf32, #tpu.memory_space<vmem>>, vector<1x8x24xf32>
    %120 = vector.shape_cast %119 : vector<1x8x24xf32> to vector<8x24xf32>
    %cst_67 = arith.constant dense<0.000000e+00> : vector<8x256xf32>
    %121 = tpu.matmul %120, %84, %cst_67 {dimension_numbers = #tpu.dot_dimension_numbers<[1], [0], [0], [1], [0, 0, 1, 1], [], []>} : vector<8x24xf32>, vector<24x256xf32>, vector<8x256xf32> -> vector<8x256xf32>
    %122 = arith.addf %118, %121 : vector<8x256xf32>
    %c255_i32_68 = arith.constant 255 : i32
    %123 = tpu.dynamic_rotate %84 by %c255_i32_68 dim 1 : vector<24x256xf32>, i32 -> vector<24x256xf32>
    %124 = vector.broadcast %5 : vector<1x256xf32> to vector<24x256xf32>
    %125 = arith.mulf %123, %124 : vector<24x256xf32>
    %c5_69 = arith.constant 5 : index
    %c0_70 = arith.constant 0 : index
    %c0_71 = arith.constant 0 : index
    %126 = vector.load %arg9[%c5_69, %c0_70, %c0_71] : memref<9x8x24xf32, #tpu.memory_space<vmem>>, vector<1x8x24xf32>
    %127 = vector.shape_cast %126 : vector<1x8x24xf32> to vector<8x24xf32>
    %cst_72 = arith.constant dense<0.000000e+00> : vector<8x256xf32>
    %128 = tpu.matmul %127, %125, %cst_72 {dimension_numbers = #tpu.dot_dimension_numbers<[1], [0], [0], [1], [0, 0, 1, 1], [], []>} : vector<8x24xf32>, vector<24x256xf32>, vector<8x256xf32> -> vector<8x256xf32>
    %129 = arith.addf %122, %128 : vector<8x256xf32>
    %c241_i32_73 = arith.constant 241 : i32
    %130 = tpu.dynamic_rotate %84 by %c241_i32_73 dim 1 : vector<24x256xf32>, i32 -> vector<24x256xf32>
    %131 = vector.broadcast %3 : vector<1x256xf32> to vector<24x256xf32>
    %132 = arith.mulf %130, %131 : vector<24x256xf32>
    %133 = vector.broadcast %4 : vector<1x256xf32> to vector<24x256xf32>
    %134 = arith.mulf %132, %133 : vector<24x256xf32>
    %c6_74 = arith.constant 6 : index
    %c0_75 = arith.constant 0 : index
    %c0_76 = arith.constant 0 : index
    %135 = vector.load %arg9[%c6_74, %c0_75, %c0_76] : memref<9x8x24xf32, #tpu.memory_space<vmem>>, vector<1x8x24xf32>
    %136 = vector.shape_cast %135 : vector<1x8x24xf32> to vector<8x24xf32>
    %cst_77 = arith.constant dense<0.000000e+00> : vector<8x256xf32>
    %137 = tpu.matmul %136, %134, %cst_77 {dimension_numbers = #tpu.dot_dimension_numbers<[1], [0], [0], [1], [0, 0, 1, 1], [], []>} : vector<8x24xf32>, vector<24x256xf32>, vector<8x256xf32> -> vector<8x256xf32>
    %138 = arith.addf %129, %137 : vector<8x256xf32>
    %c240_i32_78 = arith.constant 240 : i32
    %139 = tpu.dynamic_rotate %84 by %c240_i32_78 dim 1 : vector<24x256xf32>, i32 -> vector<24x256xf32>
    %140 = vector.broadcast %3 : vector<1x256xf32> to vector<24x256xf32>
    %141 = arith.mulf %139, %140 : vector<24x256xf32>
    %c7_79 = arith.constant 7 : index
    %c0_80 = arith.constant 0 : index
    %c0_81 = arith.constant 0 : index
    %142 = vector.load %arg9[%c7_79, %c0_80, %c0_81] : memref<9x8x24xf32, #tpu.memory_space<vmem>>, vector<1x8x24xf32>
    %143 = vector.shape_cast %142 : vector<1x8x24xf32> to vector<8x24xf32>
    %cst_82 = arith.constant dense<0.000000e+00> : vector<8x256xf32>
    %144 = tpu.matmul %143, %141, %cst_82 {dimension_numbers = #tpu.dot_dimension_numbers<[1], [0], [0], [1], [0, 0, 1, 1], [], []>} : vector<8x24xf32>, vector<24x256xf32>, vector<8x256xf32> -> vector<8x256xf32>
    %145 = arith.addf %138, %144 : vector<8x256xf32>
    %c239_i32_83 = arith.constant 239 : i32
    %146 = tpu.dynamic_rotate %84 by %c239_i32_83 dim 1 : vector<24x256xf32>, i32 -> vector<24x256xf32>
    %147 = vector.broadcast %3 : vector<1x256xf32> to vector<24x256xf32>
    %148 = arith.mulf %146, %147 : vector<24x256xf32>
    %149 = vector.broadcast %5 : vector<1x256xf32> to vector<24x256xf32>
    %150 = arith.mulf %148, %149 : vector<24x256xf32>
    %c8_84 = arith.constant 8 : index
    %c0_85 = arith.constant 0 : index
    %c0_86 = arith.constant 0 : index
    %151 = vector.load %arg9[%c8_84, %c0_85, %c0_86] : memref<9x8x24xf32, #tpu.memory_space<vmem>>, vector<1x8x24xf32>
    %152 = vector.shape_cast %151 : vector<1x8x24xf32> to vector<8x24xf32>
    %cst_87 = arith.constant dense<0.000000e+00> : vector<8x256xf32>
    %153 = tpu.matmul %152, %150, %cst_87 {dimension_numbers = #tpu.dot_dimension_numbers<[1], [0], [0], [1], [0, 0, 1, 1], [], []>} : vector<8x24xf32>, vector<24x256xf32>, vector<8x256xf32> -> vector<8x256xf32>
    %154 = arith.addf %145, %153 : vector<8x256xf32>
    %c0_88 = arith.constant 0 : index
    %c0_89 = arith.constant 0 : index
    %155 = vector.load %arg10[%c0_88, %c0_89] : memref<8x1xf32, #tpu.memory_space<vmem>>, vector<8x1xf32>
    %156 = vector.broadcast %155 : vector<8x1xf32> to vector<8x256xf32>
    %157 = arith.addf %154, %156 : vector<8x256xf32>
    %cst_90 = arith.constant 0.000000e+00 : f32
    %158 = vector.broadcast %cst_90 : f32 to vector<8x256xf32>
    %159 = arith.cmpf oge, %157, %158 : vector<8x256xf32>
    %160 = vector.broadcast %85 : f32 to vector<8x256xf32>
    %161 = arith.mulf %160, %157 : vector<8x256xf32>
    %162 = arith.select %159, %157, %161 : vector<8x256xi1>, vector<8x256xf32>
    %163 = tpu.concatenate %84, %162 in 0 : vector<24x256xf32>, vector<8x256xf32> -> vector<32x256xf32>
    %c0_91 = arith.constant 0 : index
    %c0_92 = arith.constant 0 : index
    %164 = vector.load %arg11[%c0_91, %c0_92] : memref<16x32xf32, #tpu.memory_space<vmem>>, vector<16x32xf32>
    %cst_93 = arith.constant dense<0.000000e+00> : vector<16x256xf32>
    %165 = tpu.matmul %164, %163, %cst_93 {dimension_numbers = #tpu.dot_dimension_numbers<[1], [0], [0], [1], [0, 0, 1, 1], [], []>} : vector<16x32xf32>, vector<32x256xf32>, vector<16x256xf32> -> vector<16x256xf32>
    %c0_94 = arith.constant 0 : index
    %c0_95 = arith.constant 0 : index
    %166 = vector.load %arg12[%c0_94, %c0_95] : memref<16x1xf32, #tpu.memory_space<vmem>>, vector<16x1xf32>
    %167 = vector.broadcast %166 : vector<16x1xf32> to vector<16x256xf32>
    %168 = arith.addf %165, %167 : vector<16x256xf32>
    %169 = arith.addf %168, %1 : vector<16x256xf32>
    %c2_96 = arith.constant 2 : index
    %170 = memref.load %arg2[%c2_96] : memref<4xf32, #tpu.memory_space<smem>>
    %cst_97 = arith.constant 0.000000e+00 : f32
    %171 = vector.broadcast %cst_97 : f32 to vector<8x256xf32>
    %c17_i32_98 = arith.constant 17 : i32
    %172 = tpu.dynamic_rotate %169 by %c17_i32_98 dim 1 : vector<16x256xf32>, i32 -> vector<16x256xf32>
    %173 = vector.broadcast %2 : vector<1x256xf32> to vector<16x256xf32>
    %174 = arith.mulf %172, %173 : vector<16x256xf32>
    %175 = vector.broadcast %4 : vector<1x256xf32> to vector<16x256xf32>
    %176 = arith.mulf %174, %175 : vector<16x256xf32>
    %c0_99 = arith.constant 0 : index
    %c0_100 = arith.constant 0 : index
    %c0_101 = arith.constant 0 : index
    %177 = vector.load %arg13[%c0_99, %c0_100, %c0_101] : memref<9x8x16xf32, #tpu.memory_space<vmem>>, vector<1x8x16xf32>
    %178 = vector.shape_cast %177 : vector<1x8x16xf32> to vector<8x16xf32>
    %cst_102 = arith.constant dense<0.000000e+00> : vector<8x256xf32>
    %179 = tpu.matmul %178, %176, %cst_102 {dimension_numbers = #tpu.dot_dimension_numbers<[1], [0], [0], [1], [0, 0, 1, 1], [], []>} : vector<8x16xf32>, vector<16x256xf32>, vector<8x256xf32> -> vector<8x256xf32>
    %180 = arith.addf %171, %179 : vector<8x256xf32>
    %c16_i32_103 = arith.constant 16 : i32
    %181 = tpu.dynamic_rotate %169 by %c16_i32_103 dim 1 : vector<16x256xf32>, i32 -> vector<16x256xf32>
    %182 = vector.broadcast %2 : vector<1x256xf32> to vector<16x256xf32>
    %183 = arith.mulf %181, %182 : vector<16x256xf32>
    %c1_104 = arith.constant 1 : index
    %c0_105 = arith.constant 0 : index
    %c0_106 = arith.constant 0 : index
    %184 = vector.load %arg13[%c1_104, %c0_105, %c0_106] : memref<9x8x16xf32, #tpu.memory_space<vmem>>, vector<1x8x16xf32>
    %185 = vector.shape_cast %184 : vector<1x8x16xf32> to vector<8x16xf32>
    %cst_107 = arith.constant dense<0.000000e+00> : vector<8x256xf32>
    %186 = tpu.matmul %185, %183, %cst_107 {dimension_numbers = #tpu.dot_dimension_numbers<[1], [0], [0], [1], [0, 0, 1, 1], [], []>} : vector<8x16xf32>, vector<16x256xf32>, vector<8x256xf32> -> vector<8x256xf32>
    %187 = arith.addf %180, %186 : vector<8x256xf32>
    %c15_i32_108 = arith.constant 15 : i32
    %188 = tpu.dynamic_rotate %169 by %c15_i32_108 dim 1 : vector<16x256xf32>, i32 -> vector<16x256xf32>
    %189 = vector.broadcast %2 : vector<1x256xf32> to vector<16x256xf32>
    %190 = arith.mulf %188, %189 : vector<16x256xf32>
    %191 = vector.broadcast %5 : vector<1x256xf32> to vector<16x256xf32>
    %192 = arith.mulf %190, %191 : vector<16x256xf32>
    %c2_109 = arith.constant 2 : index
    %c0_110 = arith.constant 0 : index
    %c0_111 = arith.constant 0 : index
    %193 = vector.load %arg13[%c2_109, %c0_110, %c0_111] : memref<9x8x16xf32, #tpu.memory_space<vmem>>, vector<1x8x16xf32>
    %194 = vector.shape_cast %193 : vector<1x8x16xf32> to vector<8x16xf32>
    %cst_112 = arith.constant dense<0.000000e+00> : vector<8x256xf32>
    %195 = tpu.matmul %194, %192, %cst_112 {dimension_numbers = #tpu.dot_dimension_numbers<[1], [0], [0], [1], [0, 0, 1, 1], [], []>} : vector<8x16xf32>, vector<16x256xf32>, vector<8x256xf32> -> vector<8x256xf32>
    %196 = arith.addf %187, %195 : vector<8x256xf32>
    %c1_i32_113 = arith.constant 1 : i32
    %197 = tpu.dynamic_rotate %169 by %c1_i32_113 dim 1 : vector<16x256xf32>, i32 -> vector<16x256xf32>
    %198 = vector.broadcast %4 : vector<1x256xf32> to vector<16x256xf32>
    %199 = arith.mulf %197, %198 : vector<16x256xf32>
    %c3_114 = arith.constant 3 : index
    %c0_115 = arith.constant 0 : index
    %c0_116 = arith.constant 0 : index
    %200 = vector.load %arg13[%c3_114, %c0_115, %c0_116] : memref<9x8x16xf32, #tpu.memory_space<vmem>>, vector<1x8x16xf32>
    %201 = vector.shape_cast %200 : vector<1x8x16xf32> to vector<8x16xf32>
    %cst_117 = arith.constant dense<0.000000e+00> : vector<8x256xf32>
    %202 = tpu.matmul %201, %199, %cst_117 {dimension_numbers = #tpu.dot_dimension_numbers<[1], [0], [0], [1], [0, 0, 1, 1], [], []>} : vector<8x16xf32>, vector<16x256xf32>, vector<8x256xf32> -> vector<8x256xf32>
    %203 = arith.addf %196, %202 : vector<8x256xf32>
    %c4_118 = arith.constant 4 : index
    %c0_119 = arith.constant 0 : index
    %c0_120 = arith.constant 0 : index
    %204 = vector.load %arg13[%c4_118, %c0_119, %c0_120] : memref<9x8x16xf32, #tpu.memory_space<vmem>>, vector<1x8x16xf32>
    %205 = vector.shape_cast %204 : vector<1x8x16xf32> to vector<8x16xf32>
    %cst_121 = arith.constant dense<0.000000e+00> : vector<8x256xf32>
    %206 = tpu.matmul %205, %169, %cst_121 {dimension_numbers = #tpu.dot_dimension_numbers<[1], [0], [0], [1], [0, 0, 1, 1], [], []>} : vector<8x16xf32>, vector<16x256xf32>, vector<8x256xf32> -> vector<8x256xf32>
    %207 = arith.addf %203, %206 : vector<8x256xf32>
    %c255_i32_122 = arith.constant 255 : i32
    %208 = tpu.dynamic_rotate %169 by %c255_i32_122 dim 1 : vector<16x256xf32>, i32 -> vector<16x256xf32>
    %209 = vector.broadcast %5 : vector<1x256xf32> to vector<16x256xf32>
    %210 = arith.mulf %208, %209 : vector<16x256xf32>
    %c5_123 = arith.constant 5 : index
    %c0_124 = arith.constant 0 : index
    %c0_125 = arith.constant 0 : index
    %211 = vector.load %arg13[%c5_123, %c0_124, %c0_125] : memref<9x8x16xf32, #tpu.memory_space<vmem>>, vector<1x8x16xf32>
    %212 = vector.shape_cast %211 : vector<1x8x16xf32> to vector<8x16xf32>
    %cst_126 = arith.constant dense<0.000000e+00> : vector<8x256xf32>
    %213 = tpu.matmul %212, %210, %cst_126 {dimension_numbers = #tpu.dot_dimension_numbers<[1], [0], [0], [1], [0, 0, 1, 1], [], []>} : vector<8x16xf32>, vector<16x256xf32>, vector<8x256xf32> -> vector<8x256xf32>
    %214 = arith.addf %207, %213 : vector<8x256xf32>
    %c241_i32_127 = arith.constant 241 : i32
    %215 = tpu.dynamic_rotate %169 by %c241_i32_127 dim 1 : vector<16x256xf32>, i32 -> vector<16x256xf32>
    %216 = vector.broadcast %3 : vector<1x256xf32> to vector<16x256xf32>
    %217 = arith.mulf %215, %216 : vector<16x256xf32>
    %218 = vector.broadcast %4 : vector<1x256xf32> to vector<16x256xf32>
    %219 = arith.mulf %217, %218 : vector<16x256xf32>
    %c6_128 = arith.constant 6 : index
    %c0_129 = arith.constant 0 : index
    %c0_130 = arith.constant 0 : index
    %220 = vector.load %arg13[%c6_128, %c0_129, %c0_130] : memref<9x8x16xf32, #tpu.memory_space<vmem>>, vector<1x8x16xf32>
    %221 = vector.shape_cast %220 : vector<1x8x16xf32> to vector<8x16xf32>
    %cst_131 = arith.constant dense<0.000000e+00> : vector<8x256xf32>
    %222 = tpu.matmul %221, %219, %cst_131 {dimension_numbers = #tpu.dot_dimension_numbers<[1], [0], [0], [1], [0, 0, 1, 1], [], []>} : vector<8x16xf32>, vector<16x256xf32>, vector<8x256xf32> -> vector<8x256xf32>
    %223 = arith.addf %214, %222 : vector<8x256xf32>
    %c240_i32_132 = arith.constant 240 : i32
    %224 = tpu.dynamic_rotate %169 by %c240_i32_132 dim 1 : vector<16x256xf32>, i32 -> vector<16x256xf32>
    %225 = vector.broadcast %3 : vector<1x256xf32> to vector<16x256xf32>
    %226 = arith.mulf %224, %225 : vector<16x256xf32>
    %c7_133 = arith.constant 7 : index
    %c0_134 = arith.constant 0 : index
    %c0_135 = arith.constant 0 : index
    %227 = vector.load %arg13[%c7_133, %c0_134, %c0_135] : memref<9x8x16xf32, #tpu.memory_space<vmem>>, vector<1x8x16xf32>
    %228 = vector.shape_cast %227 : vector<1x8x16xf32> to vector<8x16xf32>
    %cst_136 = arith.constant dense<0.000000e+00> : vector<8x256xf32>
    %229 = tpu.matmul %228, %226, %cst_136 {dimension_numbers = #tpu.dot_dimension_numbers<[1], [0], [0], [1], [0, 0, 1, 1], [], []>} : vector<8x16xf32>, vector<16x256xf32>, vector<8x256xf32> -> vector<8x256xf32>
    %230 = arith.addf %223, %229 : vector<8x256xf32>
    %c239_i32_137 = arith.constant 239 : i32
    %231 = tpu.dynamic_rotate %169 by %c239_i32_137 dim 1 : vector<16x256xf32>, i32 -> vector<16x256xf32>
    %232 = vector.broadcast %3 : vector<1x256xf32> to vector<16x256xf32>
    %233 = arith.mulf %231, %232 : vector<16x256xf32>
    %234 = vector.broadcast %5 : vector<1x256xf32> to vector<16x256xf32>
    %235 = arith.mulf %233, %234 : vector<16x256xf32>
    %c8_138 = arith.constant 8 : index
    %c0_139 = arith.constant 0 : index
    %c0_140 = arith.constant 0 : index
    %236 = vector.load %arg13[%c8_138, %c0_139, %c0_140] : memref<9x8x16xf32, #tpu.memory_space<vmem>>, vector<1x8x16xf32>
    %237 = vector.shape_cast %236 : vector<1x8x16xf32> to vector<8x16xf32>
    %cst_141 = arith.constant dense<0.000000e+00> : vector<8x256xf32>
    %238 = tpu.matmul %237, %235, %cst_141 {dimension_numbers = #tpu.dot_dimension_numbers<[1], [0], [0], [1], [0, 0, 1, 1], [], []>} : vector<8x16xf32>, vector<16x256xf32>, vector<8x256xf32> -> vector<8x256xf32>
    %239 = arith.addf %230, %238 : vector<8x256xf32>
    %c0_142 = arith.constant 0 : index
    %c0_143 = arith.constant 0 : index
    %240 = vector.load %arg14[%c0_142, %c0_143] : memref<8x1xf32, #tpu.memory_space<vmem>>, vector<8x1xf32>
    %241 = vector.broadcast %240 : vector<8x1xf32> to vector<8x256xf32>
    %242 = arith.addf %239, %241 : vector<8x256xf32>
    %cst_144 = arith.constant 0.000000e+00 : f32
    %243 = vector.broadcast %cst_144 : f32 to vector<8x256xf32>
    %244 = arith.cmpf oge, %242, %243 : vector<8x256xf32>
    %245 = vector.broadcast %170 : f32 to vector<8x256xf32>
    %246 = arith.mulf %245, %242 : vector<8x256xf32>
    %247 = arith.select %244, %242, %246 : vector<8x256xi1>, vector<8x256xf32>
    %248 = tpu.concatenate %169, %247 in 0 : vector<16x256xf32>, vector<8x256xf32> -> vector<24x256xf32>
    %c3_145 = arith.constant 3 : index
    %249 = memref.load %arg2[%c3_145] : memref<4xf32, #tpu.memory_space<smem>>
    %cst_146 = arith.constant 0.000000e+00 : f32
    %250 = vector.broadcast %cst_146 : f32 to vector<8x256xf32>
    %c17_i32_147 = arith.constant 17 : i32
    %251 = tpu.dynamic_rotate %248 by %c17_i32_147 dim 1 : vector<24x256xf32>, i32 -> vector<24x256xf32>
    %252 = vector.broadcast %2 : vector<1x256xf32> to vector<24x256xf32>
    %253 = arith.mulf %251, %252 : vector<24x256xf32>
    %254 = vector.broadcast %4 : vector<1x256xf32> to vector<24x256xf32>
    %255 = arith.mulf %253, %254 : vector<24x256xf32>
    %c0_148 = arith.constant 0 : index
    %c0_149 = arith.constant 0 : index
    %c0_150 = arith.constant 0 : index
    %256 = vector.load %arg15[%c0_148, %c0_149, %c0_150] : memref<9x8x24xf32, #tpu.memory_space<vmem>>, vector<1x8x24xf32>
    %257 = vector.shape_cast %256 : vector<1x8x24xf32> to vector<8x24xf32>
    %cst_151 = arith.constant dense<0.000000e+00> : vector<8x256xf32>
    %258 = tpu.matmul %257, %255, %cst_151 {dimension_numbers = #tpu.dot_dimension_numbers<[1], [0], [0], [1], [0, 0, 1, 1], [], []>} : vector<8x24xf32>, vector<24x256xf32>, vector<8x256xf32> -> vector<8x256xf32>
    %259 = arith.addf %250, %258 : vector<8x256xf32>
    %c16_i32_152 = arith.constant 16 : i32
    %260 = tpu.dynamic_rotate %248 by %c16_i32_152 dim 1 : vector<24x256xf32>, i32 -> vector<24x256xf32>
    %261 = vector.broadcast %2 : vector<1x256xf32> to vector<24x256xf32>
    %262 = arith.mulf %260, %261 : vector<24x256xf32>
    %c1_153 = arith.constant 1 : index
    %c0_154 = arith.constant 0 : index
    %c0_155 = arith.constant 0 : index
    %263 = vector.load %arg15[%c1_153, %c0_154, %c0_155] : memref<9x8x24xf32, #tpu.memory_space<vmem>>, vector<1x8x24xf32>
    %264 = vector.shape_cast %263 : vector<1x8x24xf32> to vector<8x24xf32>
    %cst_156 = arith.constant dense<0.000000e+00> : vector<8x256xf32>
    %265 = tpu.matmul %264, %262, %cst_156 {dimension_numbers = #tpu.dot_dimension_numbers<[1], [0], [0], [1], [0, 0, 1, 1], [], []>} : vector<8x24xf32>, vector<24x256xf32>, vector<8x256xf32> -> vector<8x256xf32>
    %266 = arith.addf %259, %265 : vector<8x256xf32>
    %c15_i32_157 = arith.constant 15 : i32
    %267 = tpu.dynamic_rotate %248 by %c15_i32_157 dim 1 : vector<24x256xf32>, i32 -> vector<24x256xf32>
    %268 = vector.broadcast %2 : vector<1x256xf32> to vector<24x256xf32>
    %269 = arith.mulf %267, %268 : vector<24x256xf32>
    %270 = vector.broadcast %5 : vector<1x256xf32> to vector<24x256xf32>
    %271 = arith.mulf %269, %270 : vector<24x256xf32>
    %c2_158 = arith.constant 2 : index
    %c0_159 = arith.constant 0 : index
    %c0_160 = arith.constant 0 : index
    %272 = vector.load %arg15[%c2_158, %c0_159, %c0_160] : memref<9x8x24xf32, #tpu.memory_space<vmem>>, vector<1x8x24xf32>
    %273 = vector.shape_cast %272 : vector<1x8x24xf32> to vector<8x24xf32>
    %cst_161 = arith.constant dense<0.000000e+00> : vector<8x256xf32>
    %274 = tpu.matmul %273, %271, %cst_161 {dimension_numbers = #tpu.dot_dimension_numbers<[1], [0], [0], [1], [0, 0, 1, 1], [], []>} : vector<8x24xf32>, vector<24x256xf32>, vector<8x256xf32> -> vector<8x256xf32>
    %275 = arith.addf %266, %274 : vector<8x256xf32>
    %c1_i32_162 = arith.constant 1 : i32
    %276 = tpu.dynamic_rotate %248 by %c1_i32_162 dim 1 : vector<24x256xf32>, i32 -> vector<24x256xf32>
    %277 = vector.broadcast %4 : vector<1x256xf32> to vector<24x256xf32>
    %278 = arith.mulf %276, %277 : vector<24x256xf32>
    %c3_163 = arith.constant 3 : index
    %c0_164 = arith.constant 0 : index
    %c0_165 = arith.constant 0 : index
    %279 = vector.load %arg15[%c3_163, %c0_164, %c0_165] : memref<9x8x24xf32, #tpu.memory_space<vmem>>, vector<1x8x24xf32>
    %280 = vector.shape_cast %279 : vector<1x8x24xf32> to vector<8x24xf32>
    %cst_166 = arith.constant dense<0.000000e+00> : vector<8x256xf32>
    %281 = tpu.matmul %280, %278, %cst_166 {dimension_numbers = #tpu.dot_dimension_numbers<[1], [0], [0], [1], [0, 0, 1, 1], [], []>} : vector<8x24xf32>, vector<24x256xf32>, vector<8x256xf32> -> vector<8x256xf32>
    %282 = arith.addf %275, %281 : vector<8x256xf32>
    %c4_167 = arith.constant 4 : index
    %c0_168 = arith.constant 0 : index
    %c0_169 = arith.constant 0 : index
    %283 = vector.load %arg15[%c4_167, %c0_168, %c0_169] : memref<9x8x24xf32, #tpu.memory_space<vmem>>, vector<1x8x24xf32>
    %284 = vector.shape_cast %283 : vector<1x8x24xf32> to vector<8x24xf32>
    %cst_170 = arith.constant dense<0.000000e+00> : vector<8x256xf32>
    %285 = tpu.matmul %284, %248, %cst_170 {dimension_numbers = #tpu.dot_dimension_numbers<[1], [0], [0], [1], [0, 0, 1, 1], [], []>} : vector<8x24xf32>, vector<24x256xf32>, vector<8x256xf32> -> vector<8x256xf32>
    %286 = arith.addf %282, %285 : vector<8x256xf32>
    %c255_i32_171 = arith.constant 255 : i32
    %287 = tpu.dynamic_rotate %248 by %c255_i32_171 dim 1 : vector<24x256xf32>, i32 -> vector<24x256xf32>
    %288 = vector.broadcast %5 : vector<1x256xf32> to vector<24x256xf32>
    %289 = arith.mulf %287, %288 : vector<24x256xf32>
    %c5_172 = arith.constant 5 : index
    %c0_173 = arith.constant 0 : index
    %c0_174 = arith.constant 0 : index
    %290 = vector.load %arg15[%c5_172, %c0_173, %c0_174] : memref<9x8x24xf32, #tpu.memory_space<vmem>>, vector<1x8x24xf32>
    %291 = vector.shape_cast %290 : vector<1x8x24xf32> to vector<8x24xf32>
    %cst_175 = arith.constant dense<0.000000e+00> : vector<8x256xf32>
    %292 = tpu.matmul %291, %289, %cst_175 {dimension_numbers = #tpu.dot_dimension_numbers<[1], [0], [0], [1], [0, 0, 1, 1], [], []>} : vector<8x24xf32>, vector<24x256xf32>, vector<8x256xf32> -> vector<8x256xf32>
    %293 = arith.addf %286, %292 : vector<8x256xf32>
    %c241_i32_176 = arith.constant 241 : i32
    %294 = tpu.dynamic_rotate %248 by %c241_i32_176 dim 1 : vector<24x256xf32>, i32 -> vector<24x256xf32>
    %295 = vector.broadcast %3 : vector<1x256xf32> to vector<24x256xf32>
    %296 = arith.mulf %294, %295 : vector<24x256xf32>
    %297 = vector.broadcast %4 : vector<1x256xf32> to vector<24x256xf32>
    %298 = arith.mulf %296, %297 : vector<24x256xf32>
    %c6_177 = arith.constant 6 : index
    %c0_178 = arith.constant 0 : index
    %c0_179 = arith.constant 0 : index
    %299 = vector.load %arg15[%c6_177, %c0_178, %c0_179] : memref<9x8x24xf32, #tpu.memory_space<vmem>>, vector<1x8x24xf32>
    %300 = vector.shape_cast %299 : vector<1x8x24xf32> to vector<8x24xf32>
    %cst_180 = arith.constant dense<0.000000e+00> : vector<8x256xf32>
    %301 = tpu.matmul %300, %298, %cst_180 {dimension_numbers = #tpu.dot_dimension_numbers<[1], [0], [0], [1], [0, 0, 1, 1], [], []>} : vector<8x24xf32>, vector<24x256xf32>, vector<8x256xf32> -> vector<8x256xf32>
    %302 = arith.addf %293, %301 : vector<8x256xf32>
    %c240_i32_181 = arith.constant 240 : i32
    %303 = tpu.dynamic_rotate %248 by %c240_i32_181 dim 1 : vector<24x256xf32>, i32 -> vector<24x256xf32>
    %304 = vector.broadcast %3 : vector<1x256xf32> to vector<24x256xf32>
    %305 = arith.mulf %303, %304 : vector<24x256xf32>
    %c7_182 = arith.constant 7 : index
    %c0_183 = arith.constant 0 : index
    %c0_184 = arith.constant 0 : index
    %306 = vector.load %arg15[%c7_182, %c0_183, %c0_184] : memref<9x8x24xf32, #tpu.memory_space<vmem>>, vector<1x8x24xf32>
    %307 = vector.shape_cast %306 : vector<1x8x24xf32> to vector<8x24xf32>
    %cst_185 = arith.constant dense<0.000000e+00> : vector<8x256xf32>
    %308 = tpu.matmul %307, %305, %cst_185 {dimension_numbers = #tpu.dot_dimension_numbers<[1], [0], [0], [1], [0, 0, 1, 1], [], []>} : vector<8x24xf32>, vector<24x256xf32>, vector<8x256xf32> -> vector<8x256xf32>
    %309 = arith.addf %302, %308 : vector<8x256xf32>
    %c239_i32_186 = arith.constant 239 : i32
    %310 = tpu.dynamic_rotate %248 by %c239_i32_186 dim 1 : vector<24x256xf32>, i32 -> vector<24x256xf32>
    %311 = vector.broadcast %3 : vector<1x256xf32> to vector<24x256xf32>
    %312 = arith.mulf %310, %311 : vector<24x256xf32>
    %313 = vector.broadcast %5 : vector<1x256xf32> to vector<24x256xf32>
    %314 = arith.mulf %312, %313 : vector<24x256xf32>
    %c8_187 = arith.constant 8 : index
    %c0_188 = arith.constant 0 : index
    %c0_189 = arith.constant 0 : index
    %315 = vector.load %arg15[%c8_187, %c0_188, %c0_189] : memref<9x8x24xf32, #tpu.memory_space<vmem>>, vector<1x8x24xf32>
    %316 = vector.shape_cast %315 : vector<1x8x24xf32> to vector<8x24xf32>
    %cst_190 = arith.constant dense<0.000000e+00> : vector<8x256xf32>
    %317 = tpu.matmul %316, %314, %cst_190 {dimension_numbers = #tpu.dot_dimension_numbers<[1], [0], [0], [1], [0, 0, 1, 1], [], []>} : vector<8x24xf32>, vector<24x256xf32>, vector<8x256xf32> -> vector<8x256xf32>
    %318 = arith.addf %309, %317 : vector<8x256xf32>
    %c0_191 = arith.constant 0 : index
    %c0_192 = arith.constant 0 : index
    %319 = vector.load %arg16[%c0_191, %c0_192] : memref<8x1xf32, #tpu.memory_space<vmem>>, vector<8x1xf32>
    %320 = vector.broadcast %319 : vector<8x1xf32> to vector<8x256xf32>
    %321 = arith.addf %318, %320 : vector<8x256xf32>
    %cst_193 = arith.constant 0.000000e+00 : f32
    %322 = vector.broadcast %cst_193 : f32 to vector<8x256xf32>
    %323 = arith.cmpf oge, %321, %322 : vector<8x256xf32>
    %324 = vector.broadcast %249 : f32 to vector<8x256xf32>
    %325 = arith.mulf %324, %321 : vector<8x256xf32>
    %326 = arith.select %323, %321, %325 : vector<8x256xi1>, vector<8x256xf32>
    %327 = tpu.concatenate %248, %326 in 0 : vector<24x256xf32>, vector<8x256xf32> -> vector<32x256xf32>
    %c0_194 = arith.constant 0 : index
    %c0_195 = arith.constant 0 : index
    %328 = vector.load %arg17[%c0_194, %c0_195] : memref<16x32xf32, #tpu.memory_space<vmem>>, vector<16x32xf32>
    %cst_196 = arith.constant dense<0.000000e+00> : vector<16x256xf32>
    %329 = tpu.matmul %328, %327, %cst_196 {dimension_numbers = #tpu.dot_dimension_numbers<[1], [0], [0], [1], [0, 0, 1, 1], [], []>} : vector<16x32xf32>, vector<32x256xf32>, vector<16x256xf32> -> vector<16x256xf32>
    %c0_197 = arith.constant 0 : index
    %c0_198 = arith.constant 0 : index
    %330 = vector.load %arg18[%c0_197, %c0_198] : memref<16x1xf32, #tpu.memory_space<vmem>>, vector<16x1xf32>
    %331 = vector.broadcast %330 : vector<16x1xf32> to vector<16x256xf32>
    %332 = arith.addf %329, %331 : vector<16x256xf32>
    %333 = arith.addf %332, %169 : vector<16x256xf32>
    %334 = tpu.concatenate %169, %333 in 0 : vector<16x256xf32>, vector<16x256xf32> -> vector<32x256xf32>
    %c0_199 = arith.constant 0 : index
    %c0_200 = arith.constant 0 : index
    %335 = vector.load %arg19[%c0_199, %c0_200] : memref<16x32xf32, #tpu.memory_space<vmem>>, vector<16x32xf32>
    %cst_201 = arith.constant dense<0.000000e+00> : vector<16x256xf32>
    %336 = tpu.matmul %335, %334, %cst_201 {dimension_numbers = #tpu.dot_dimension_numbers<[1], [0], [0], [1], [0, 0, 1, 1], [], []>} : vector<16x32xf32>, vector<32x256xf32>, vector<16x256xf32> -> vector<16x256xf32>
    %c0_202 = arith.constant 0 : index
    %c0_203 = arith.constant 0 : index
    %337 = vector.load %arg20[%c0_202, %c0_203] : memref<16x1xf32, #tpu.memory_space<vmem>>, vector<16x1xf32>
    %338 = vector.broadcast %337 : vector<16x1xf32> to vector<16x256xf32>
    %339 = arith.addf %336, %338 : vector<16x256xf32>
    %c0_204 = arith.constant 0 : index
    %c0_205 = arith.constant 0 : index
    %c0_206 = arith.constant 0 : index
    %340 = vector.load %arg21[%c0_204, %c0_205, %c0_206] : memref<1x16x256xf32, #tpu.memory_space<vmem>>, vector<1x16x256xf32>
    %341 = vector.shape_cast %340 : vector<1x16x256xf32> to vector<16x256xf32>
    %342 = vector.shape_cast %339 : vector<16x256xf32> to vector<1x16x256xf32>
    tpu.vector_store %arg21[%c0_204, %c0_205, %c0_206], %342 {strides = array<i32>} : memref<1x16x256xf32, #tpu.memory_space<vmem>>, vector<1x16x256xf32>,
    return
  }
  func.func @transform_0(%arg0: i32) -> (i32, i32, i32) {
    %c0_i32 = arith.constant 0 : i32
    %c0_i32_0 = arith.constant 0 : i32
    %c0_i32_1 = arith.constant 0 : i32
    return %arg0, %c0_i32, %c0_i32_0 : i32, i32, i32
  }
  func.func @transform_1(%arg0: i32) -> i32 {
    %c0_i32 = arith.constant 0 : i32
    %c0_i32_0 = arith.constant 0 : i32
    return %c0_i32 : i32
  }
  func.func @transform_2(%arg0: i32) -> (i32, i32) {
    %c0_i32 = arith.constant 0 : i32
    %c0_i32_0 = arith.constant 0 : i32
    %c0_i32_1 = arith.constant 0 : i32
    return %c0_i32, %c0_i32_0 : i32, i32
  }
  func.func @transform_3(%arg0: i32) -> (i32, i32) {
    %c0_i32 = arith.constant 0 : i32
    %c0_i32_0 = arith.constant 0 : i32
    %c0_i32_1 = arith.constant 0 : i32
    return %c0_i32, %c0_i32_0 : i32, i32
  }
  func.func @transform_4(%arg0: i32) -> (i32, i32) {
    %c0_i32 = arith.constant 0 : i32
    %c0_i32_0 = arith.constant 0 : i32
    %c0_i32_1 = arith.constant 0 : i32
    return %c0_i32, %c0_i32_0 : i32, i32
  }
  func.func @transform_5(%arg0: i32) -> (i32, i32) {
    %c0_i32 = arith.constant 0 : i32
    %c0_i32_0 = arith.constant 0 : i32
    %c0_i32_1 = arith.constant 0 : i32
    return %c0_i32, %c0_i32_0 : i32, i32
  }
  func.func @transform_6(%arg0: i32) -> (i32, i32, i32) {
    %c0_i32 = arith.constant 0 : i32
    %c0_i32_0 = arith.constant 0 : i32
    %c0_i32_1 = arith.constant 0 : i32
    %c0_i32_2 = arith.constant 0 : i32
    return %c0_i32, %c0_i32_0, %c0_i32_1 : i32, i32, i32
  }
  func.func @transform_7(%arg0: i32) -> (i32, i32) {
    %c0_i32 = arith.constant 0 : i32
    %c0_i32_0 = arith.constant 0 : i32
    %c0_i32_1 = arith.constant 0 : i32
    return %c0_i32, %c0_i32_0 : i32, i32
  }
  func.func @transform_8(%arg0: i32) -> (i32, i32, i32) {
    %c0_i32 = arith.constant 0 : i32
    %c0_i32_0 = arith.constant 0 : i32
    %c0_i32_1 = arith.constant 0 : i32
    %c0_i32_2 = arith.constant 0 : i32
    return %c0_i32, %c0_i32_0, %c0_i32_1 : i32, i32, i32
  }
  func.func @transform_9(%arg0: i32) -> (i32, i32) {
    %c0_i32 = arith.constant 0 : i32
    %c0_i32_0 = arith.constant 0 : i32
    %c0_i32_1 = arith.constant 0 : i32
    return %c0_i32, %c0_i32_0 : i32, i32
  }
  func.func @transform_10(%arg0: i32) -> (i32, i32) {
    %c0_i32 = arith.constant 0 : i32
    %c0_i32_0 = arith.constant 0 : i32
    %c0_i32_1 = arith.constant 0 : i32
    return %c0_i32, %c0_i32_0 : i32, i32
  }
  func.func @transform_11(%arg0: i32) -> (i32, i32) {
    %c0_i32 = arith.constant 0 : i32
    %c0_i32_0 = arith.constant 0 : i32
    %c0_i32_1 = arith.constant 0 : i32
    return %c0_i32, %c0_i32_0 : i32, i32
  }
  func.func @transform_12(%arg0: i32) -> (i32, i32, i32) {
    %c0_i32 = arith.constant 0 : i32
    %c0_i32_0 = arith.constant 0 : i32
    %c0_i32_1 = arith.constant 0 : i32
    %c0_i32_2 = arith.constant 0 : i32
    return %c0_i32, %c0_i32_0, %c0_i32_1 : i32, i32, i32
  }
  func.func @transform_13(%arg0: i32) -> (i32, i32) {
    %c0_i32 = arith.constant 0 : i32
    %c0_i32_0 = arith.constant 0 : i32
    %c0_i32_1 = arith.constant 0 : i32
    return %c0_i32, %c0_i32_0 : i32, i32
  }
  func.func @transform_14(%arg0: i32) -> (i32, i32, i32) {
    %c0_i32 = arith.constant 0 : i32
    %c0_i32_0 = arith.constant 0 : i32
    %c0_i32_1 = arith.constant 0 : i32
    %c0_i32_2 = arith.constant 0 : i32
    return %c0_i32, %c0_i32_0, %c0_i32_1 : i32, i32, i32
  }
  func.func @transform_15(%arg0: i32) -> (i32, i32) {
    %c0_i32 = arith.constant 0 : i32
    %c0_i32_0 = arith.constant 0 : i32
    %c0_i32_1 = arith.constant 0 : i32
    return %c0_i32, %c0_i32_0 : i32, i32
  }
  func.func @transform_16(%arg0: i32) -> (i32, i32) {
    %c0_i32 = arith.constant 0 : i32
    %c0_i32_0 = arith.constant 0 : i32
    %c0_i32_1 = arith.constant 0 : i32
    return %c0_i32, %c0_i32_0 : i32, i32
  }
  func.func @transform_17(%arg0: i32) -> (i32, i32) {
    %c0_i32 = arith.constant 0 : i32
    %c0_i32_0 = arith.constant 0 : i32
    %c0_i32_1 = arith.constant 0 : i32
    return %c0_i32, %c0_i32_0 : i32, i32
  }
  func.func @transform_18(%arg0: i32) -> (i32, i32) {
    %c0_i32 = arith.constant 0 : i32
    %c0_i32_0 = arith.constant 0 : i32
    %c0_i32_1 = arith.constant 0 : i32
    return %c0_i32, %c0_i32_0 : i32, i32
  }
  func.func @transform_19(%arg0: i32) -> (i32, i32) {
    %c0_i32 = arith.constant 0 : i32
    %c0_i32_0 = arith.constant 0 : i32
    %c0_i32_1 = arith.constant 0 : i32
    return %c0_i32, %c0_i32_0 : i32, i32
  }
  func.func @transform_20(%arg0: i32) -> (i32, i32, i32) {
    %c0_i32 = arith.constant 0 : i32
    %c0_i32_0 = arith.constant 0 : i32
    %c0_i32_1 = arith.constant 0 : i32
    return %arg0, %c0_i32, %c0_i32_0 : i32, i32, i32
  }
}

</mosaic_0001>

<bundles_post_ra>
// kernel: tpu_custom_call.1
= control target key start
LH: loop header
LB: loop body
LE: loop exit
PB: predicated region body
PF: predicated region fallthrough
CT: control target
= control target key end

     0   :  { %s5461_s0 = inlined_call_operand.hbm [shape: f32[2,16,256], index: 0, kind: input, shape index: {}]   ;;  %s5462_s1 = inlined_call_operand.hbm [shape: f32[4], index: 1, kind: input, shape index: {}]   ;;  %s5463_s2 = inlined_call_operand.hbm [shape: f32[1,256], index: 2, kind: input, shape index: {}]   ;;  %s5464_s3 = inlined_call_operand.hbm [shape: f32[1,256], index: 3, kind: input, shape index: {}]   ;;  %s5465_s4 = inlined_call_operand.hbm [shape: f32[1,256], index: 4, kind: input, shape index: {}]   ;;  %s5466_s5 = inlined_call_operand.hbm [shape: f32[1,256], index: 5, kind: input, shape index: {}]   ;;  %s5467_s6 = inlined_call_operand.vmem [shape: f32[9,8,16], index: 6, kind: input, shape index: {}]   ;;  %s5468_s7 = inlined_call_operand.vmem [shape: f32[8,1], index: 7, kind: input, shape index: {}]   ;;  %s5469_s8 = inlined_call_operand.hbm [shape: f32[9,8,24], index: 8, kind: input, shape index: {}]   ;;  %s5470_s9 = inlined_call_operand.vmem [shape: f32[8,1], index: 9, kind: input, shape index: {}]   ;;  %s5471_s10 = inlined_call_operand.vmem [shape: f32[16,32], index: 10, kind: input, shape index: {}]   ;;  %s5472_s11 = inlined_call_operand.vmem [shape: f32[16,1], index: 11, kind: input, shape index: {}]   ;;  %s5473_s12 = inlined_call_operand.hbm [shape: f32[9,8,16], index: 12, kind: input, shape index: {}]   ;;  %s5474_s13 = inlined_call_operand.vmem [shape: f32[8,1], index: 13, kind: input, shape index: {}]   ;;  %s5475_s14 = inlined_call_operand.hbm [shape: f32[9,8,24], index: 14, kind: input, shape index: {}]   ;;  %s5476_s15 = inlined_call_operand.vmem [shape: f32[8,1], index: 15, kind: input, shape index: {}]   ;;  %s5477_s16 = inlined_call_operand.hbm [shape: f32[16,32], index: 16, kind: input, shape index: {}]   ;;  %s5478_s17 = inlined_call_operand.vmem [shape: f32[16,1], index: 17, kind: input, shape index: {}]   ;;  %s5479_s18 = inlined_call_operand.vmem [shape: f32[16,32], index: 18, kind: input, shape index: {}]   ;;  %s5480_s19 = inlined_call_operand.vmem [shape: f32[16,1], index: 19, kind: input, shape index: {}]   ;;  %s5481_s20 = inlined_call_operand.hbm [shape: f32[2,16,256], index: 20, kind: output, shape index: {}]  }
   0x1   :  { %5501 = sst [smem:[#allocation35_spill]] %s5461_s0 }
   0x2   :  { %5502 = sst [smem:[#allocation36_spill]] %s5462_s1 }
   0x3   :  { %5503 = sst [smem:[#allocation37_spill]] %s5463_s2 }
   0x4   :  { %5504 = sst [smem:[#allocation38_spill]] %s5464_s3 }
   0x5   :  { %5505 = sst [smem:[#allocation39_spill]] %s5465_s4 }
   0x6   :  { %5506 = sst [smem:[#allocation40_spill]] %s5466_s5 }
   0x7   :  { %5507 = sst [smem:[#allocation41_spill]] %s5469_s8 }
   0x8   :  { %5508 = sst [smem:[#allocation42_spill]] %s5473_s12 }
   0x9   :  { %5509 = sst [smem:[#allocation43_spill]] %s5474_s13 }
   0xa   :  { %5510 = sst [smem:[#allocation44_spill]] %s5475_s14 }
   0xb   :  { %5511 = sst [smem:[#allocation45_spill]] %s5476_s15 }
   0xc   :  { %5512 = sst [smem:[#allocation46_spill]] %s5477_s16 }
   0xd   :  { %5513 = sst [smem:[#allocation47_spill]] %s5478_s17 }
   0xe   :  { %5514 = sst [smem:[#allocation48_spill]] %s5479_s18 }
   0xf   :  { %5515 = sst [smem:[#allocation49_spill]] %s5480_s19 }
  0x10   :  { %5516 = sst [smem:[#allocation50_spill]] %s5481_s20 }
  0x11   :  { %25 = vsyncpa [#allocation3], 0 }
  0x12   :  { %27 = vsyncpa [#allocation3 + $0x1], 0 }
  0x13   :  { %28 = vsyncpa [#allocation5], 0 }
  0x14   :  { %29 = vsyncpa [#allocation8], 0 }
  0x15   :  { %30 = vsyncpa [#allocation11], 0 }
  0x16   :  { %31 = vsyncpa [#allocation14], 0 }
  0x17   :  { %32 = vsyncpa [#allocation17], 0 }
  0x18   :  { %33 = vsyncpa [#allocation4], 0 }
  0x19   :  { %35 = vsyncpa [#allocation4 + $0x1], 0  ;;  %s4171_s1 = smov 0   ;;  %s4173_s22 = smov 0  }
  0x1a   :  { %s4175_s23 = smov 0   ;;  %s4177_s24 = smov 0  }
  0x1b LB: > { %s5517_s3 = sld [smem:[#allocation37_spill]]  ;;  %s4195_s27 = sadd.s32 4294967295, %s4041_s24   ;;  %s4041_s24 = sphi %s4177_s24, %s5572_s24   ;;  %s4037_s23 = sphi %s4175_s23, %s5571_s23   ;;  %s4033_s22 = sphi %s4173_s22, %s5570_s22   ;;  %s4029_s1 = sphi %s4171_s1, %s5569_s1  }
  0x1c   : > { %p3385_p0 = scmp.ge.s32.totalorder %s4041_s24, 1  ;;  %p62_p1 = scmp.eq.s32.totalorder %s4195_s27, 0 }
  0x1d   : > { %p497_p2 = scmp.lt.s32.totalorder %s4041_s24, 3  ;;  %s4043_s4 = smov [#allocation7]  }
  0x1e   : > { %s521_s29 = sshll.u32 %s4043_s4, 4  ;;  %s5519_s21 = sld [smem:[#allocation39_spill]]  ;;  %s522_s29 = int_to_ptr.vmem [resolvable:$true] %s521_s29 }
  0x1f   : > { %p4200_p3 = pnand %p3385_p0, %p497_p2  ;;  %s5521_s8 = sld [smem:[#allocation41_spill]] }
  0x20   : > { %s4045_s30 = smov [#allocation13]   ;;  %s5522_s14 = sld [smem:[#allocation44_spill]] }
  0x21   : > { %s519_s26 = sshll.u32 %s5517_s3, 4  ;;  %p3553_p5 = pneg %p4200_p3  ;;  %s520_s26 = int_to_ptr.hbm [resolvable:$true] %s519_s26 }
  0x22   : > { %s4044_s3 = smov [#allocation10]   ;;  %s574_s0 = sshll.u32 %s4045_s30, 4  ;;  %s575_s0 = int_to_ptr.vmem [resolvable:$true] %s574_s0 }
  0x23   : > { %p4212_p6 = pnand %p3553_p5, %p62_p1  ;;  %s545_s20 = sshll.u32 %s4044_s3, 4  ;;  %s546_s20 = int_to_ptr.vmem [resolvable:$true] %s545_s20 }
  0x24   : > { %s543_s2 = sshll.u32 %s5519_s21, 4  ;;  %s4046_s3 = smov 128   ;;  %s544_s2 = int_to_ptr.hbm [resolvable:$true] %s543_s2 }
  0x25   : > { %s572_s19 = sshll.u32 %s5521_s8, 4  ;;  %s4047_s13 = smov 8   ;;  %s573_s19 = int_to_ptr.hbm [resolvable:$true] %s572_s19 }
  0x26   : > { %3559 = dma.hbm_to_vmem [thread:$0]  (!%p4212_p6), %s520_s26, 32, %s522_s29, [#allocation8]  }
  0x27   : > { %3565 = dma.hbm_to_vmem [thread:$0]  (!%p4212_p6), %s544_s2, 32, %s546_s20, [#allocation11]  }
  0x28   : > { %s612_s17 = sshll.u32 %s5522_s14, 4  ;;  %s4048_s18 = smov [#allocation16]   ;;  %s613_s17 = int_to_ptr.hbm [resolvable:$true] %s612_s17 }
  0x29   : > { %3571 = dma.hbm_to_vmem [thread:$0]  (!%p4212_p6), %s573_s19, 1152, %s575_s0, [#allocation14], %s4046_s3, %s4046_s3, %s4047_s13  }
  0x2a   : > { %s614_s26 = sshll.u32 %s4048_s18, 4  ;;  %s5523_s2 = sld [smem:[#allocation36_spill]]  ;;  %s615_s26 = int_to_ptr.vmem [resolvable:$true] %s614_s26 }
  0x2b   : > { %3577 = dma.hbm_to_vmem [thread:$0]  (!%p4212_p6), %s613_s17, 1152, %s615_s26, [#allocation17], %s4046_s3, %s4046_s3, %s4047_s13  }
  0x2c   : > { %s5524_s21 = sld [smem:[#allocation38_spill]]  ;;  %s4049_s0 = smov [#allocation6]  }
  0x2d   : > { %s4050_s18 = smov [#allocation9]   ;;  %s5525_s5 = sld [smem:[#allocation40_spill]] }
  0x2e   : > { %s533_s8 = sshll.u32 %s4050_s18, 4  ;;  %s5526_s12 = sld [smem:[#allocation42_spill]]  ;;  %s534_s8 = int_to_ptr.vmem [resolvable:$true] %s533_s8 }
  0x2f   : > { %s4051_s30 = smov [#allocation12]   ;;  %s5527_s16 = sld [smem:[#allocation46_spill]] }
  0x30   : > { %s509_s4 = sshll.u32 %s5523_s2, 4  ;;  %s4053_s20 = smov [#allocation18]   ;;  %s510_s4 = int_to_ptr.hbm [resolvable:$true] %s509_s4 }
  0x31   : > { %3556 = dma.hbm_to_smem (!%p4212_p6), %s510_s4, 16, %s4049_s0, [#allocation5]  }
  0x32   : > { %s531_s19 = sshll.u32 %s5524_s21, 4  ;;  %s557_s4 = sshll.u32 %s4051_s30, 4  ;;  %s532_s19 = int_to_ptr.hbm [resolvable:$true] %s531_s19  ;;  %s558_s4 = int_to_ptr.vmem [resolvable:$true] %s557_s4 }
  0x33   : > { %s555_s2 = sshll.u32 %s5525_s5, 4  ;;  %s4052_s21 = smov [#allocation15]   ;;  %s556_s2 = int_to_ptr.hbm [resolvable:$true] %s555_s2 }
  0x34   : > { %3562 = dma.hbm_to_vmem [thread:$0]  (!%p4212_p6), %s532_s19, 32, %s534_s8, [#allocation8]  }
  0x35   : > { %s595_s15 = sshll.u32 %s5526_s12, 4  ;;  %s597_s8 = sshll.u32 %s4052_s21, 4  ;;  %s596_s15 = int_to_ptr.hbm [resolvable:$true] %s595_s15  ;;  %s598_s8 = int_to_ptr.vmem [resolvable:$true] %s597_s8 }
  0x36   : > { %3568 = dma.hbm_to_vmem [thread:$0]  (!%p4212_p6), %s556_s2, 32, %s558_s4, [#allocation11]  }
  0x37   : > { %s629_s18 = sshll.u32 %s5527_s16, 4  ;;  %s631_s29 = sshll.u32 %s4053_s20, 4  ;;  %s630_s18 = int_to_ptr.hbm [resolvable:$true] %s629_s18  ;;  %s632_s29 = int_to_ptr.vmem [resolvable:$true] %s631_s29 }
  0x38   : > { %3574 = dma.hbm_to_vmem [thread:$0]  (!%p4212_p6), %s596_s15, 1152, %s598_s8, [#allocation14], %s4046_s3, %s4046_s3, %s4047_s13  }
  0x39   : > { %3580 = dma.hbm_to_vmem [thread:$0]  (!%p4212_p6), %s630_s18, 256, %s632_s29, [#allocation17], %s4046_s3, %s4046_s3, %s4047_s13  }
  0x3a   : > { %s3384_s2 = sadd.s32 4294967294, %s4041_s24   ;;  %s4269_s17 = sadd.s32 1, %s4041_s24  }
  0x3b   : > { %s48_s26 = sadd.s32 1, %s4037_s23  ;;  %s45_s30 = ssub.s32 %s4041_s24, %s4269_s17 }
  0x3c   : > { %p55_p7 = scmp.ne.s32.totalorder %s4037_s23, %s4033_s22  ;;  %p46_p8 = scmp.eq.s32.totalorder %s45_s30, 0 }
  0x3d   : > { %p56_p9 = scmp.eq.s32.totalorder %s4041_s24, 0  ;;  %p61_p10 = scmp.ne.s32.totalorder %s4033_s22, %s4029_s1 }
  0x3e   : > { %p484_p11 = scmp.eq.s32.totalorder %s4195_s27, 1  ;;  %p490_p2 = scmp.eq.s32.totalorder %s3384_s2, 1 }
  0x3f   : > { %s4281_s15 = scalar_select %p46_p8, %s4037_s23, %s48_s26  }
  0x40   : > { %p4283_p12 = por %p56_p9, %p55_p7  ;;  %p4289_p13 = por %p62_p1, %p61_p10 }
  0x41   : > { %p4293_p0 = por %p484_p11, %p55_p7  ;;  %p3598_p5 = scmp.lt.s32.totalorder %s4041_s24, 2 }
  0x42   : > { %s654_s4 = sand.u32 1, %s4037_s23   ;;  %p4299_p6 = por %p490_p2, %p61_p10 }
  0x43   : > { %s3396_s8 = sshll.u32 %s654_s4, 5  ;;  %s3511_s19 = sshll.u32 %s4041_s24, 5 }
  0x44   : > { %s5532_s20 = sld [smem:[#allocation35_spill]]  ;;  %s658_s30 = scalar_lea.vmem [#allocation2], %s3396_s8 }
  0x45   : > { %s666_s5 = sshll.u32 %s658_s30, 4  ;;  %p4309_p7 = pnand %p3598_p5, %p4283_p12  ;;  %s667_s5 = int_to_ptr.vmem [resolvable:$true] %s666_s5 }
  0x46   : > { %s655_s12 = scalar_lea.sflag [#allocation3], %s654_s4 }
  0x47   : > { %p3929_p9 = pneg %p4309_p7 }
  0x4a   : > { %s663_s29 = scalar_lea.hbm %s5532_s20, %s3511_s19  ;;  %s3932_s0 = scalar_lea.hbm %s5532_s20, 64 }
  0x4b   : > { %s664_s26 = sshll.u32 %s663_s29, 4  ;;  %s665_s26 = int_to_ptr.hbm [resolvable:$true] %s664_s26 }
  0x4c   : > { %s3925_s14 = sshra.s32 %s665_s26, 4  ;;  %s3926_s14 = int_to_ptr.hbm [resolvable:$true] %s3925_s14 }
  0x4d   : > { %s3927_s16 = scalar_lea.hbm %s3926_s14, 32  ;;  %p3933_p12 = scmp.lt.s32.totalorder %s3926_s14, %s5532_s20 }
  0x4e   : > { %p3928_p8 = scmp.ne.s32.totalorder %s3926_s14, %s3927_s16  ;;  %p3934_p2 = scmp.lt.s32.totalorder %s3932_s0, %s3927_s16 }
  0x50   : > { %p3930_p10 = pnand %p3929_p9, %p3928_p8  ;;  %p3935_p5 = por %p3934_p2, %p3933_p12 }
  0x52   : > { %p3931_p11 = pneg %p3930_p10 }
  0x54   : > { %p3936_p4 = pnand %p3935_p5, %p3931_p11 }
  0x56   : > { %3939 = shalt.err (!%p3936_p4)
}
  0x57   : > { %s4054_s4 = smov 256   ;;  %s4055_s29 = smov 16  }
  0x58   : > { %3584 = dma.hbm_to_vmem [thread:$0]  (!%p4309_p7), %s665_s26, 512, %s667_s5, %s655_s12, %s4054_s4, %s4054_s4, %s4055_s29  }
  0x59   : > { %678 = sbr.rel (%p4200_p3) target bundleno = 1817 (0x719), region = 100 }
  0x5e   : > { %s4326_s30 = sand.u32 1, %s4033_s22  }
  0x5f   : > { %s3400_s14 = sshll.u32 %s4326_s30, 5  ;;  %s681_s16 = scalar_lea.sflag [#allocation3], %s4326_s30 }
  0x60   : > { %s4332_s19 = scalar_lea.vmem [#allocation2], %s3400_s14 }
  0x61   : > { %4000 = dma.done.wait (%p4289_p13), %s681_s16, 512  }
  0x62   : > { %4002 = vsyncadd (%p4289_p13), %s681_s16, 4294966784 }
  0x63   : > { %4004 = dma.done.wait (%p62_p1), [#allocation5], 16  }
  0x64   : > { %4006 = vsyncadd (%p62_p1), [#allocation5], 4294967280 }
  0x65   : > { %4008 = dma.done.wait (%p62_p1), [#allocation8], 64  }
  0x66   : > { %4010 = vsyncadd (%p62_p1), [#allocation8], 4294967232 }
  0x67   : > { %4012 = dma.done.wait (%p62_p1), [#allocation11], 64  }
  0x68   : > { %4014 = vsyncadd (%p62_p1), [#allocation11], 4294967232 }
  0x69   : > { %4016 = dma.done.wait (%p62_p1), [#allocation14], 2304  }
  0x6a   : > { %4018 = vsyncadd (%p62_p1), [#allocation14], 4294964992 }
  0x6b   : > { %4020 = dma.done.wait (%p62_p1), [#allocation17], 1408  }
  0x6c   : > { %4022 = vsyncadd (%p62_p1), [#allocation17], 4294965888 }
  0x6d   : > { %735 = sfence }
  0x6e   : > { %v4359_v0 = vld [vmem:[%s4332_s19 + $0x10] sm:$0xff]  ;;  %v4362_v1 = vld [vmem:[%s4332_s19] sm:$0xff]  ;;  %s4056_s5 = smov 17   ;;  %s4057_s12 = smov 16   ;;  %v4371_v2 = vld [vmem:[%s4332_s19 + $0x18] sm:$0xff]  ;;  %v805_v4 = vlaneseq  ;;  %vm850_vm2 = vcmask 130048  }
  0x6f   : > { %799 = vrot.lane.b32.xlu0 %v4359_v0, %s4056_s5  ;;  %797 = vrot.lane.b32.xlu1 %v4362_v1, %s4056_s5  ;;  %v4374_v3 = vld [vmem:[%s4332_s19 + $0x8] sm:$0xff]  ;;  %s4058_s28 = smov 15   ;;  %s4059_s13 = smov 1   ;;  %v792_v7 = vld [vmem:[#allocation7] sm:$0x3]  ;;  %v3416_v63 = vld [vmem:[%s5467_s6 + $0x10] sm:$0xff] }
  0x70   : > { %833 = vrot.lane.b32.xlu2 %v4359_v0, %s4057_s12  ;;  %s4060_s26 = smov 127   ;;  %s4061_s2 = smov 113   ;;  %v4434_v6 = vand.u32 127, %v805_v4  ;;  %v4437_v8 = vperm.slane %v792_v7, 0  ;;  %v4439_v9 = vperm.slane %v792_v7, 1  ;;  %v830_v36 = vld [vmem:[%s5467_s6] sm:$0xff] }
  0x71   : > { %s4062_s8 = smov 112   ;;  %s4063_s0 = smov 111   ;;  %v794_v18 = vld [vmem:[#allocation10] sm:$0x3]  ;;  %v3411_v43 = vld [vmem:[%s5467_s6 + $0x8] sm:$0xff]  ;;  %vm1427_vm11 = vcmask 195584  }
  0x72   : > { %vm839_vm0 = vcmp.lt.s32.totalorder %v4434_v6, 16  ;;  %vm807_vm1 = vcmp.lt.s32.totalorder %v4434_v6, 17  ;;  %v4454_v21 = vperm.slane %v794_v18, 0  ;;  %v4456_v22 = vperm.slane %v794_v18, 1  ;;  %v795_v45 = vld [vmem:[#allocation12] sm:$0x3] }
  0x73   : > { %vm945_vm3 = vcmp.lt.s32.totalorder %v4434_v6, 15  ;;  %v4509_v48 = vperm.slane %v795_v45, 0  ;;  %v4511_v49 = vperm.slane %v795_v45, 1  ;;  %vm1018_vm4 = vcmp.lt.s32.totalorder %v4434_v6, 1  ;;  %s796_s18 = sld [smem:[#allocation6]] }
  0x74   : > { %vm1129_vm5 = vcmp.lt.s32.totalorder %v4434_v6, 127  ;;  %vm1193_vm6 = vcmp.lt.s32.totalorder %v4434_v6, 113  ;;  %vm1266_vm7 = vcmp.lt.s32.totalorder %v4434_v6, 112  ;;  %vm1330_vm8 = vcmp.lt.s32.totalorder %v4434_v6, 111  ;;  %s3437_s4 = sld [smem:[#allocation6 + $0x1]] }
  0x75   : > { %vm1926_vm14 = vcmask 261120   ;;  %s5546_s29 = sld [smem:[#allocation43_spill]] }
  0x76   : > { %s3460_s16 = sld [smem:[#allocation6 + $0x2]] }
  0x77   : > { %803 = vrot.lane.b32.xlu0 %v4371_v2, %s4056_s5  ;;  %801 = vrot.lane.b32.xlu1 %v4374_v3, %s4056_s5  ;;  %s5566_s25 = sld [smem:[#allocation48_spill]] }
  0x78   : > { %837 = vrot.lane.b32.xlu2 %v4371_v2, %s4057_s12 }
  0x7f   : > { %831 = vrot.lane.b32.xlu0 %v4362_v1, %s4057_s12  ;;  %835 = vrot.lane.b32.xlu1 %v4374_v3, %s4057_s12 }
  0x80   : > { %939 = vrot.lane.b32.xlu2 %v4359_v0, %s4058_s28 }
  0x87   : > { %943 = vrot.lane.b32.xlu0 %v4371_v2, %s4058_s28  ;;  %937 = vrot.lane.b32.xlu1 %v4362_v1, %s4058_s28 }
  0x88   : > { %941 = vrot.lane.b32.xlu2 %v4374_v3, %s4058_s28 }
  0x8f   : > { %1012 = vrot.lane.b32.xlu0 %v4359_v0, %s4059_s13  ;;  %1016 = vrot.lane.b32.xlu1 %v4371_v2, %s4059_s13 }
  0x90   : > { %1010 = vrot.lane.b32.xlu2 %v4362_v1, %s4059_s13 }
  0x97   : > { %1014 = vrot.lane.b32.xlu0 %v4374_v3, %s4059_s13  ;;  %1123 = vrot.lane.b32.xlu1 %v4359_v0, %s4060_s26 }
  0x98   : > { %1127 = vrot.lane.b32.xlu2 %v4371_v2, %s4060_s26 }
  0x9f   : > { %1121 = vrot.lane.b32.xlu0 %v4362_v1, %s4060_s26  ;;  %1125 = vrot.lane.b32.xlu1 %v4374_v3, %s4060_s26 }
  0xa0   : > { %1187 = vrot.lane.b32.xlu2 %v4359_v0, %s4061_s2 }
  0xa7   : > { %1191 = vrot.lane.b32.xlu0 %v4371_v2, %s4061_s2  ;;  %1185 = vrot.lane.b32.xlu1 %v4362_v1, %s4061_s2 }
  0xa8   : > { %1189 = vrot.lane.b32.xlu2 %v4374_v3, %s4061_s2 }
  0xaf   : > { %1260 = vrot.lane.b32.xlu0 %v4359_v0, %s4062_s8  ;;  %1264 = vrot.lane.b32.xlu1 %v4371_v2, %s4062_s8 }
  0xb0   : > { %1258 = vrot.lane.b32.xlu2 %v4362_v1, %s4062_s8 }
  0xb7   : > { %1262 = vrot.lane.b32.xlu0 %v4374_v3, %s4062_s8  ;;  %1324 = vrot.lane.b32.xlu1 %v4359_v0, %s4063_s0 }
  0xb8   : > { %1328 = vrot.lane.b32.xlu2 %v4371_v2, %s4063_s0 }
  0xbf   : > { %1322 = vrot.lane.b32.xlu0 %v4362_v1, %s4063_s0  ;;  %1326 = vrot.lane.b32.xlu1 %v4374_v3, %s4063_s0 }
  0xca   : > { %v834_v5 = vpop.permute.xlu2 %833 }
  0xd2   : > { %v838_v10 = vpop.permute.xlu2 %837 }
  0xd3   : > { %v841_v11 = vsel %vm839_vm0, %v834_v5, %v838_v10  ;;  %v843_v12 = vsel %vm839_vm0, %v838_v10, %v834_v5 }
  0xd4   : > { %v4446_v13 = vmul.f32 %v843_v12, %v4437_v8  ;;  %v4449_v14 = vmul.f32 %v841_v11, %v4439_v9 }
  0xd6   : > { %868 = vmatpush.msra.mxu0 %v4446_v13  ;;  %888 = vmatpush.msra.mxu1 %v4449_v14 }
  0xda   : > { %v940_v15 = vpop.permute.xlu2 %939 }
  0xe1   : > { %v800_v16 = vpop.permute.xlu0 %799  ;;  %v798_v17 = vpop.permute.xlu1 %797 }
  0xe2   : > { %v942_v27 = vpop.permute.xlu2 %941 }
  0xe9   : > { %v804_v19 = vpop.permute.xlu0 %803  ;;  %v802_v20 = vpop.permute.xlu1 %801 }
  0xea   : > { %v809_v23 = vsel %vm807_vm1, %v800_v16, %v804_v19  ;;  %v811_v24 = vsel %vm807_vm1, %v804_v19, %v800_v16  ;;  %v808_v25 = vsel %vm807_vm1, %v798_v17, %v802_v20  ;;  %v810_v26 = vsel %vm807_vm1, %v802_v20, %v798_v17  ;;  %v1011_v44 = vpop.permute.xlu2 %1010 }
  0xeb   : > { %v819_v28 = vmul.f32 %v4437_v8, %v811_v24  ;;  %v820_v29 = vmul.f32 %v4439_v9, %v809_v23  ;;  %v817_v30 = vmul.f32 %v4437_v8, %v810_v26  ;;  %v818_v31 = vmul.f32 %v4439_v9, %v808_v25 }
  0xed   : > { %v4471_v32 = vmul.f32 %v4454_v21, %v819_v28  ;;  %v4474_v33 = vmul.f32 %v4456_v22, %v820_v29  ;;  %v4479_v34 = vmul.f32 %v4454_v21, %v817_v30  ;;  %v4482_v35 = vmul.f32 %v4456_v22, %v818_v31  ;;  %v3419_v29 = vld [vmem:[%s5467_s6 + $0x18] sm:$0xff] }
  0xef   : > { %911 = vmatpush.msra.mxu2 %v4471_v32  ;;  %931 = vmatpush.msra.mxu3 %v4474_v33 }
  0xf1   : > { %v832_v37 = vpop.permute.xlu0 %831  ;;  %912 = vmatpush.msra.mxu2 %v4479_v34  ;;  %932 = vmatpush.msra.mxu3 %v4482_v35  ;;  %v836_v38 = vpop.permute.xlu1 %835 }
  0xf2   : > { %v840_v39 = vsel %vm839_vm0, %v832_v37, %v836_v38  ;;  %v842_v40 = vsel %vm839_vm0, %v836_v38, %v832_v37  ;;  %3414 = vmatmul.msk.f32.vlgmr.msra.gmra.mxu2 %vm850_vm2, %v830_v36  ;;  %3415 = vmatmul.msk.f32.vlgmr.msra.gmra.mxu3 %vm850_vm2, %v830_v36  ;;  %v1128_v60 = vpop.permute.xlu2 %1127 }
  0xf3   : > { %v4496_v41 = vmul.f32 %v842_v40, %v4437_v8  ;;  %v4499_v42 = vmul.f32 %v840_v39, %v4439_v9 }
  0xf5   : > { %869 = vmatpush.msra.mxu0 %v4496_v41  ;;  %889 = vmatpush.msra.mxu1 %v4499_v42 }
  0xf6   : > { %3412 = vmatmul.msk.f32.vlgmr.msra.gmra.mxu0 %vm850_vm2, %v3411_v43  ;;  %3413 = vmatmul.msk.f32.vlgmr.msra.gmra.mxu1 %vm850_vm2, %v3411_v43  ;;  %v793_v43 = vld [vmem:[#allocation9] sm:$0x3] }
  0xf7   : > { %v4614_v45 = vperm.slane %v793_v43, 0 }
  0xf9   : > { %v944_v46 = vpop.permute.xlu0 %943  ;;  %v938_v47 = vpop.permute.xlu1 %937 }
  0xfa   : > { %v947_v50 = vsel %vm945_vm3, %v940_v15, %v944_v46  ;;  %v949_v51 = vsel %vm945_vm3, %v944_v46, %v940_v15  ;;  %v946_v52 = vsel %vm945_vm3, %v938_v47, %v942_v27  ;;  %v948_v53 = vsel %vm945_vm3, %v942_v27, %v938_v47  ;;  %v3422_v15 = vld [vmem:[%s5467_s6 + $0x20] sm:$0xff]  ;;  %v1188_v16 = vpop.permute.xlu2 %1187 }
  0xfb   : > { %v952_v54 = vmul.f32 %v949_v51, %v4437_v8  ;;  %v953_v55 = vmul.f32 %v947_v50, %v4439_v9  ;;  %v950_v56 = vmul.f32 %v948_v53, %v4437_v8  ;;  %v951_v57 = vmul.f32 %v946_v52, %v4439_v9  ;;  %v1390_v47 = vld [vmem:[%s5468_s7] sm:$0xff] }
  0xfc   : > { %v4616_v46 = vperm.slane %v793_v43, 1  ;;  %v4064_v52 = vmov 0  }
  0xfd   : > { %v4526_v58 = vmul.f32 %v4509_v48, %v952_v54  ;;  %v4529_v59 = vmul.f32 %v4511_v49, %v953_v55  ;;  %v4534_v61 = vmul.f32 %v4509_v48, %v950_v56  ;;  %v4537_v62 = vmul.f32 %v4511_v49, %v951_v57  ;;  %3664 = vset.pattern.permute.xlu2 %v4064_v52 }
  0xfe   : > { %3665 = vset.pattern.permute.xlu1 %v4064_v52  ;;  %1393 = vperm.xlu2 %3664, %v1390_v47  }
  0xff   : > { %982 = vmatpush.msrb.mxu0 %v4526_v58  ;;  %1002 = vmatpush.msrb.mxu1 %v4529_v59 }
 0x100   : > { %3666 = vset.pattern.permute.xlu0 %v4064_v52 }
 0x101   : > { %v1013_v4 = vpop.permute.xlu0 %1012  ;;  %983 = vmatpush.msrb.mxu0 %v4534_v61  ;;  %1003 = vmatpush.msrb.mxu1 %v4537_v62  ;;  %v1017_v5 = vpop.permute.xlu1 %1016 }
 0x102   : > { %v1020_v7 = vsel %vm1018_vm4, %v1013_v4, %v1017_v5  ;;  %v1022_v10 = vsel %vm1018_vm4, %v1017_v5, %v1013_v4  ;;  %3417 = vmatmul.msk.f32.vlgmr.msrb.gmra.mxu0 %vm850_vm2, %v3416_v63  ;;  %3418 = vmatmul.msk.f32.vlgmr.msrb.gmra.mxu1 %vm850_vm2, %v3416_v63  ;;  %v1190_v40 = vpop.permute.xlu2 %1189 }
 0x103   : > { %v4552_v11 = vmul.f32 %v1022_v10, %v4454_v21  ;;  %v4555_v12 = vmul.f32 %v1020_v7, %v4456_v22  ;;  %1093 = vmatpush.msra.mxu0 %v4359_v0  ;;  %1113 = vmatpush.msra.mxu1 %v4371_v2 }
 0x105   : > { %1046 = vmatpush.msrb.mxu2 %v4552_v11  ;;  %1066 = vmatpush.msrb.mxu3 %v4555_v12 }
 0x106   : > { %1094 = vmatpush.msra.mxu0 %v4362_v1  ;;  %1114 = vmatpush.msra.mxu1 %v4374_v3 }
 0x109   : > { %v1015_v17 = vpop.permute.xlu0 %1014  ;;  %v1124_v18 = vpop.permute.xlu1 %1123 }
 0x10a   : > { %v1019_v19 = vsel %vm1018_vm4, %v1011_v44, %v1015_v17  ;;  %v1021_v20 = vsel %vm1018_vm4, %v1015_v17, %v1011_v44  ;;  %v1131_v23 = vsel %vm1129_vm5, %v1124_v18, %v1128_v60  ;;  %v1133_v24 = vsel %vm1129_vm5, %v1128_v60, %v1124_v18  ;;  %3423 = vmatmul.msk.f32.vlgmr.msra.gmra.mxu0 %vm850_vm2, %v3422_v15  ;;  %v3425_v44 = vld [vmem:[%s5467_s6 + $0x28] sm:$0xff]  ;;  %v1259_v10 = vpop.permute.xlu2 %1258  ;;  %v3428_v17 = vld [vmem:[%s5467_s6 + $0x30] sm:$0xff] }
 0x10b   : > { %v4577_v25 = vmul.f32 %v1131_v23, %v4509_v48  ;;  %v4580_v26 = vmul.f32 %v1133_v24, %v4511_v49  ;;  %v4583_v27 = vmul.f32 %v1021_v20, %v4454_v21  ;;  %v4586_v28 = vmul.f32 %v1019_v19, %v4456_v22  ;;  %3424 = vmatmul.msk.f32.vlgmr.msra.gmra.mxu1 %vm850_vm2, %v3422_v15 }
 0x10d   : > { %1047 = vmatpush.msrb.mxu2 %v4583_v27  ;;  %1067 = vmatpush.msrb.mxu3 %v4586_v28 }
 0x10e   : > { %3420 = vmatmul.msk.f32.vlgmr.msrb.gmra.mxu2 %vm850_vm2, %v3419_v29  ;;  %3421 = vmatmul.msk.f32.vlgmr.msrb.gmra.mxu3 %vm850_vm2, %v3419_v29 }
 0x10f   : > { %1157 = vmatpush.msra.mxu2 %v4577_v25  ;;  %1177 = vmatpush.msra.mxu3 %v4580_v26 }
 0x111   : > { %v1122_v30 = vpop.permute.xlu0 %1121  ;;  %v1126_v31 = vpop.permute.xlu1 %1125 }
 0x112   : > { %v1130_v36 = vsel %vm1129_vm5, %v1122_v30, %v1126_v31  ;;  %v1132_v37 = vsel %vm1129_vm5, %v1126_v31, %v1122_v30  ;;  %v1329_v30 = vpop.permute.xlu2 %1328 }
 0x113   : > { %v4603_v38 = vmul.f32 %v1130_v36, %v4509_v48  ;;  %v4606_v39 = vmul.f32 %v1132_v37, %v4511_v49 }
 0x115   : > { %1158 = vmatpush.msra.mxu2 %v4603_v38  ;;  %1178 = vmatpush.msra.mxu3 %v4606_v39 }
 0x116   : > { %3426 = vmatmul.msk.f32.vlgmr.msra.gmra.mxu2 %vm850_vm2, %v3425_v44  ;;  %3427 = vmatmul.msk.f32.vlgmr.msra.gmra.mxu3 %vm850_vm2, %v3425_v44 }
 0x119   : > { %v1192_v50 = vpop.permute.xlu0 %1191  ;;  %v1186_v51 = vpop.permute.xlu1 %1185 }
 0x11a   : > { %v1195_v53 = vsel %vm1193_vm6, %v1188_v16, %v1192_v50  ;;  %v1197_v54 = vsel %vm1193_vm6, %v1192_v50, %v1188_v16  ;;  %v1194_v55 = vsel %vm1193_vm6, %v1186_v51, %v1190_v40  ;;  %v1196_v56 = vsel %vm1193_vm6, %v1190_v40, %v1186_v51 }
 0x11b   : > { %v1205_v57 = vmul.f32 %v4614_v45, %v1195_v53  ;;  %v1206_v60 = vmul.f32 %v4616_v46, %v1197_v54  ;;  %v1203_v63 = vmul.f32 %v4614_v45, %v1194_v55  ;;  %v1204_v4 = vmul.f32 %v4616_v46, %v1196_v56  ;;  %v3431_v53 = vld [vmem:[%s5467_s6 + $0x38] sm:$0xff] }
 0x11d   : > { %v4636_v5 = vmul.f32 %v1205_v57, %v4454_v21  ;;  %v4639_v7 = vmul.f32 %v1206_v60, %v4456_v22  ;;  %v4644_v15 = vmul.f32 %v1203_v63, %v4454_v21  ;;  %v4647_v16 = vmul.f32 %v1204_v4, %v4456_v22 }
 0x11f   : > { %1230 = vmatpush.msrb.mxu0 %v4636_v5  ;;  %1250 = vmatpush.msrb.mxu1 %v4639_v7 }
 0x121   : > { %v1261_v18 = vpop.permute.xlu0 %1260  ;;  %1231 = vmatpush.msrb.mxu0 %v4644_v15  ;;  %1251 = vmatpush.msrb.mxu1 %v4647_v16  ;;  %v1265_v19 = vpop.permute.xlu1 %1264 }
 0x122   : > { %v1268_v20 = vsel %vm1266_vm7, %v1261_v18, %v1265_v19  ;;  %v1270_v23 = vsel %vm1266_vm7, %v1265_v19, %v1261_v18  ;;  %3429 = vmatmul.msk.f32.vlgmr.msrb.gmra.mxu0 %vm850_vm2, %v3428_v17  ;;  %3430 = vmatmul.msk.f32.vlgmr.msrb.gmra.mxu1 %vm850_vm2, %v3428_v17  ;;  %v3434_v19 = vld [vmem:[%s5467_s6 + $0x40] sm:$0xff] }
 0x123   : > { %v4662_v24 = vmul.f32 %v1268_v20, %v4614_v45  ;;  %v4665_v29 = vmul.f32 %v1270_v23, %v4616_v46 }
 0x125   : > { %5534 = vst [vmem:[#allocation27_spill] sm:$0xff] %v4662_v24  ;;  %1294 = vmatpush.msrb.mxu2 %v4662_v24  ;;  %1314 = vmatpush.msrb.mxu3 %v4665_v29 }
 0x126   : > { %5535 = vst [vmem:[#allocation28_spill] sm:$0xff] %v4665_v29 }
 0x129   : > { %v1263_v31 = vpop.permute.xlu0 %1262  ;;  %v1325_v36 = vpop.permute.xlu1 %1324 }
 0x12a   : > { %v1267_v37 = vsel %vm1266_vm7, %v1259_v10, %v1263_v31  ;;  %v1269_v40 = vsel %vm1266_vm7, %v1263_v31, %v1259_v10  ;;  %v1332_v43 = vsel %vm1330_vm8, %v1325_v36, %v1329_v30  ;;  %v1334_v44 = vsel %vm1330_vm8, %v1329_v30, %v1325_v36 }
 0x12b   : > { %v4679_v47 = vmul.f32 %v1267_v37, %v4614_v45  ;;  %v4682_v50 = vmul.f32 %v1269_v40, %v4616_v46  ;;  %v1337_v51 = vmul.f32 %v1332_v43, %v4614_v45  ;;  %v1338_v52 = vmul.f32 %v1334_v44, %v4616_v46 }
 0x12d   : > { %5536 = vst [vmem:[#allocation29_spill] sm:$0xff] %v4679_v47  ;;  %v4690_v54 = vmul.f32 %v1337_v51, %v4509_v48  ;;  %v4693_v55 = vmul.f32 %v1338_v52, %v4511_v49  ;;  %1295 = vmatpush.msrb.mxu2 %v4679_v47  ;;  %1315 = vmatpush.msrb.mxu3 %v4682_v50 }
 0x12e   : > { %5537 = vst [vmem:[#allocation30_spill] sm:$0xff] %v4682_v50  ;;  %3432 = vmatmul.msk.f32.vlgmr.msrb.gmra.mxu2 %vm850_vm2, %v3431_v53  ;;  %3433 = vmatmul.msk.f32.vlgmr.msrb.gmra.mxu3 %vm850_vm2, %v3431_v53 }
 0x12f   : > { %1362 = vmatpush.msra.mxu0 %v4690_v54  ;;  %1382 = vmatpush.msra.mxu1 %v4693_v55 }
 0x131   : > { %v1323_v56 = vpop.permute.xlu0 %1322  ;;  %v1327_v57 = vpop.permute.xlu1 %1326 }
 0x132   : > { %v1331_v60 = vsel %vm1330_vm8, %v1323_v56, %v1327_v57  ;;  %v1333_v63 = vsel %vm1330_vm8, %v1327_v57, %v1323_v56 }
 0x133   : > { %v1335_v4 = vmul.f32 %v1331_v60, %v4614_v45  ;;  %v1336_v10 = vmul.f32 %v1333_v63, %v4616_v46 }
 0x135   : > { %v4708_v17 = vmul.f32 %v1335_v4, %v4509_v48  ;;  %v4711_v18 = vmul.f32 %v1336_v10, %v4511_v49 }
 0x137   : > { %5538 = vst [vmem:[#allocation31_spill] sm:$0xff] %v4708_v17  ;;  %1363 = vmatpush.msra.mxu0 %v4708_v17  ;;  %1383 = vmatpush.msra.mxu1 %v4711_v18 }
 0x138   : > { %5539 = vst [vmem:[#allocation32_spill] sm:$0xff] %v4711_v18  ;;  %3435 = vmatmul.msk.f32.vlgmr.msra.gmra.mxu0 %vm850_vm2, %v3434_v19  ;;  %3436 = vmatmul.msk.f32.vlgmr.msra.gmra.mxu1 %vm850_vm2, %v3434_v19 }
 0x173   : > { %v871_v20 = vpop.f32.mrf.mxu0  ;;  %v891_v23 = vpop.f32.mrf.mxu1 }
 0x175   : > { %v914_v30 = vpop.f32.mrf.mxu2  ;;  %v934_v31 = vpop.f32.mrf.mxu3 }
 0x176   : > { %v915_v40 = vadd.f32 %v914_v30, %v871_v20  ;;  %v935_v43 = vadd.f32 %v934_v31, %v891_v23 }
 0x17f   : > { %v985_v36 = vpop.f32.mrf.mxu0  ;;  %v1005_v37 = vpop.f32.mrf.mxu1 }
 0x180   : > { %v1008_v52 = vadd.f32 %v985_v36, %v915_v40  ;;  %v1009_v53 = vadd.f32 %v1005_v37, %v935_v43  ;;  %v1394_v37 = vpop.permute.xlu2 %1393 }
 0x187   : > { %v1096_v56 = vpop.f32.mrf.mxu0 }
 0x188   : > { %v1116_v57 = vpop.f32.mrf.mxu1 }
 0x191   : > { %v1049_v44 = vpop.f32.mrf.mxu2  ;;  %v1069_v51 = vpop.f32.mrf.mxu3 }
 0x192   : > { %v1072_v60 = vadd.f32 %v1049_v44, %v1008_v52  ;;  %v1073_v63 = vadd.f32 %v1069_v51, %v1009_v53  ;;  %v1400_v52 = vstv %s796_s18 }
 0x194   : > { %v1119_v50 = vadd.f32 %v1096_v56, %v1072_v60  ;;  %v1120_v19 = vadd.f32 %v1116_v57, %v1073_v63 }
 0x199   : > { %v1160_v4 = vpop.f32.mrf.mxu2  ;;  %v1180_v10 = vpop.f32.mrf.mxu3 }
 0x19a   : > { %v1183_v24 = vadd.f32 %v1160_v4, %v1119_v50  ;;  %v1184_v18 = vadd.f32 %v1180_v10, %v1120_v19 }
 0x19f   : > { %v1233_v47 = vpop.f32.mrf.mxu0  ;;  %v1253_v29 = vpop.f32.mrf.mxu1 }
 0x1a0   : > { %v1256_v23 = vadd.f32 %v1233_v47, %v1183_v24  ;;  %v1257_v30 = vadd.f32 %v1253_v29, %v1184_v18  ;;  %v1915_v24 = vld [vmem:[%s5472_s11 + $0x8] sm:$0xff] }
 0x1b1   : > { %v1297_v17 = vpop.f32.mrf.mxu2  ;;  %v1317_v20 = vpop.f32.mrf.mxu3 }
 0x1b2   : > { %v1320_v31 = vadd.f32 %v1297_v17, %v1256_v23  ;;  %v1321_v36 = vadd.f32 %v1317_v20, %v1257_v30  ;;  %v1426_v23 = vld [vmem:[#allocation13 + $0x8] sm:$0xff] }
 0x1b5   : > { %v1365_v40 = vpop.f32.mrf.mxu0  ;;  %v1385_v43 = vpop.f32.mrf.mxu1 }
 0x1b6   : > { %v1388_v44 = vadd.f32 %v1365_v40, %v1320_v31  ;;  %v1389_v51 = vadd.f32 %v1385_v43, %v1321_v36 }
 0x1b8   : > { %v1396_v53 = vadd.f32 %v1394_v37, %v1388_v44  ;;  %v1397_v56 = vadd.f32 %v1394_v37, %v1389_v51 }
 0x1ba   : > { %vm1398_vm9 = vcmp.ge.f32.partialorder %v1396_v53, 0.0  ;;  %vm1399_vm10 = vcmp.ge.f32.partialorder %v1397_v56, 0.0  ;;  %v1401_v57 = vmul.f32 %v1400_v52, %v1396_v53  ;;  %v1402_v50 = vmul.f32 %v1400_v52, %v1397_v56 }
 0x1bc   : > { %v4720_v60 = vsel %vm1398_vm9, %v1396_v53, %v1401_v57  ;;  %v4722_v63 = vsel %vm1399_vm10, %v1397_v56, %v1402_v50 }
 0x1bd   : > { %1419 = vrot.lane.b32.xlu1 %v4722_v63, %s4057_s12  ;;  %1514 = vrot.lane.b32.xlu2 %v4720_v60, %s4058_s28 }
 0x1be   : > { %1417 = vrot.lane.b32.xlu0 %v4720_v60, %s4057_s12 }
 0x1c5   : > { %1406 = vrot.lane.b32.xlu1 %v4720_v60, %s4056_s5  ;;  %1408 = vrot.lane.b32.xlu2 %v4722_v63, %s4056_s5 }
 0x1c6   : > { %1516 = vrot.lane.b32.xlu0 %v4722_v63, %s4058_s28 }
 0x1cd   : > { %1573 = vrot.lane.b32.xlu1 %v4722_v63, %s4059_s13  ;;  %1728 = vrot.lane.b32.xlu2 %v4720_v60, %s4061_s2 }
 0x1ce   : > { %1571 = vrot.lane.b32.xlu0 %v4720_v60, %s4059_s13 }
 0x1d5   : > { %1673 = vrot.lane.b32.xlu1 %v4720_v60, %s4060_s26  ;;  %1675 = vrot.lane.b32.xlu2 %v4722_v63, %s4060_s26 }
 0x1d6   : > { %1730 = vrot.lane.b32.xlu0 %v4722_v63, %s4061_s2 }
 0x1dd   : > { %1842 = vrot.lane.b32.xlu1 %v4722_v63, %s4063_s0  ;;  %1785 = vrot.lane.b32.xlu2 %v4720_v60, %s4062_s8 }
 0x1de   : > { %1840 = vrot.lane.b32.xlu0 %v4720_v60, %s4063_s0 }
 0x1e5   : > { %1923 = vperm.xlu2 %3664, %v1915_v24   ;;  %v1416_v24 = vld [vmem:[#allocation13] sm:$0xff] }
 0x1e6   : > { %1787 = vrot.lane.b32.xlu0 %v4722_v63, %s4062_s8 }
 0x217   : > { %v1515_v29 = vpop.permute.xlu2 %1514 }
 0x21f   : > { %v1409_v20 = vpop.permute.xlu2 %1408 }
 0x227   : > { %v1729_v56 = vpop.permute.xlu2 %1728 }
 0x22f   : > { %v1420_v47 = vpop.permute.xlu1 %1419 }
 0x230   : > { %v1418_v17 = vpop.permute.xlu0 %1417 }
 0x231   : > { %v1421_v18 = vsel %vm839_vm0, %v1418_v17, %v1420_v47  ;;  %v1422_v4 = vsel %vm839_vm0, %v1420_v47, %v1418_v17  ;;  %v1525_v17 = vld [vmem:[#allocation13 + $0x10] sm:$0xff] }
 0x232   : > { %v1423_v10 = vmul.f32 %v1422_v4, %v4437_v8  ;;  %v1424_v19 = vmul.f32 %v1421_v18, %v4439_v9 }
 0x234   : > { %1444 = vmatpush.msra.mxu2 %v1423_v10  ;;  %1464 = vmatpush.msra.mxu3 %v1424_v19 }
 0x236   : > { %1445 = vmatpush.msra.mxu2 %v4446_v13  ;;  %1465 = vmatpush.msra.mxu3 %v4449_v14 }
 0x237   : > { %v1407_v30 = vpop.permute.xlu1 %1406 }
 0x238   : > { %v1410_v31 = vsel %vm807_vm1, %v1407_v30, %v1409_v20  ;;  %v1411_v36 = vsel %vm807_vm1, %v1409_v20, %v1407_v30  ;;  %1446 = vmatpush.msra.mxu2 %v4496_v41  ;;  %1466 = vmatpush.msra.mxu3 %v4499_v42  ;;  %v1517_v37 = vpop.permute.xlu0 %1516 }
 0x239   : > { %v1412_v40 = vmul.f32 %v1411_v36, %v4437_v8  ;;  %v1413_v13 = vmul.f32 %v1410_v31, %v4439_v9  ;;  %v1518_v14 = vsel %vm945_vm3, %v1515_v29, %v1517_v37  ;;  %v1519_v43 = vsel %vm945_vm3, %v1517_v37, %v1515_v29  ;;  %3438 = vmatmul.msk.f32.vlgmr.msra.gmra.mxu2 %vm1427_vm11, %v1426_v23  ;;  %v1682_v31 = vld [vmem:[#allocation13 + $0x28] sm:$0xff] }
 0x23a   : > { %v1520_v44 = vmul.f32 %v1519_v43, %v4437_v8  ;;  %v1521_v51 = vmul.f32 %v1518_v14, %v4439_v9  ;;  %3439 = vmatmul.msk.f32.vlgmr.msra.gmra.mxu3 %vm1427_vm11, %v1426_v23 }
 0x23b   : > { %v1414_v41 = vmul.f32 %v1412_v40, %v4454_v21  ;;  %v1415_v42 = vmul.f32 %v1413_v13, %v4456_v22  ;;  %v1739_v40 = vld [vmem:[#allocation13 + $0x30] sm:$0xff] }
 0x23c   : > { %v1522_v52 = vmul.f32 %v1520_v44, %v4509_v48  ;;  %v1523_v53 = vmul.f32 %v1521_v51, %v4511_v49  ;;  %v5540_v44 = vld [vmem:[#allocation31_spill] sm:$0xff]  ;;  %v5541_v51 = vld [vmem:[#allocation32_spill] sm:$0xff] }
 0x23d   : > { %1487 = vmatpush.msrb.mxu0 %v1414_v41  ;;  %1507 = vmatpush.msrb.mxu1 %v1415_v42  ;;  %v1851_v41 = vld [vmem:[#allocation13 + $0x40] sm:$0xff]  ;;  %v1794_v42 = vld [vmem:[#allocation13 + $0x38] sm:$0xff] }
 0x23e   : > { %1542 = vmatpush.msrb.mxu2 %v1522_v52  ;;  %1562 = vmatpush.msrb.mxu3 %v1523_v53  ;;  %v5544_v52 = vld [vmem:[#allocation29_spill] sm:$0xff]  ;;  %v5545_v53 = vld [vmem:[#allocation30_spill] sm:$0xff] }
 0x23f   : > { %v1574_v57 = vpop.permute.xlu1 %1573  ;;  %1488 = vmatpush.msrb.mxu0 %v4471_v32  ;;  %1508 = vmatpush.msrb.mxu1 %v4474_v33 }
 0x240   : > { %1543 = vmatpush.msrb.mxu2 %v4526_v58  ;;  %1563 = vmatpush.msrb.mxu3 %v4529_v59  ;;  %v1572_v50 = vpop.permute.xlu0 %1571 }
 0x241   : > { %v1575_v29 = vsel %vm1018_vm4, %v1572_v50, %v1574_v57  ;;  %v1576_v47 = vsel %vm1018_vm4, %v1574_v57, %v1572_v50  ;;  %1489 = vmatpush.msrb.mxu0 %v4479_v34  ;;  %1509 = vmatpush.msrb.mxu1 %v4482_v35  ;;  %v1676_v34 = vpop.permute.xlu2 %1675 }
 0x242   : > { %v1577_v32 = vmul.f32 %v1576_v47, %v4454_v21  ;;  %v1578_v33 = vmul.f32 %v1575_v29, %v4456_v22  ;;  %1544 = vmatpush.msrb.mxu2 %v4534_v61  ;;  %1564 = vmatpush.msrb.mxu3 %v4537_v62  ;;  %v1580_v62 = vld [vmem:[#allocation13 + $0x18] sm:$0xff] }
 0x243   : > { %3440 = vmatmul.msk.f32.vlgmr.msrb.gmra.mxu0 %vm1427_vm11, %v1416_v24  ;;  %3441 = vmatmul.msk.f32.vlgmr.msrb.gmra.mxu1 %vm1427_vm11, %v1416_v24 }
 0x244   : > { %3442 = vmatmul.msk.f32.vlgmr.msrb.gmra.mxu2 %vm1427_vm11, %v1525_v17  ;;  %3443 = vmatmul.msk.f32.vlgmr.msrb.gmra.mxu3 %vm1427_vm11, %v1525_v17 }
 0x245   : > { %1644 = vmatpush.msra.mxu2 %v4720_v60  ;;  %1664 = vmatpush.msra.mxu3 %v4722_v63 }
 0x246   : > { %1597 = vmatpush.msra.mxu0 %v1577_v32  ;;  %1617 = vmatpush.msra.mxu1 %v1578_v33 }
 0x247   : > { %v1674_v35 = vpop.permute.xlu1 %1673  ;;  %1645 = vmatpush.msra.mxu2 %v4359_v0  ;;  %1665 = vmatpush.msra.mxu3 %v4371_v2 }
 0x248   : > { %1598 = vmatpush.msra.mxu0 %v4552_v11  ;;  %1618 = vmatpush.msra.mxu1 %v4555_v12  ;;  %v1677_v58 = vsel %vm1129_vm5, %v1674_v35, %v1676_v34  ;;  %v1678_v59 = vsel %vm1129_vm5, %v1676_v34, %v1674_v35  ;;  %v1731_v61 = vpop.permute.xlu0 %1730  ;;  %v1627_v11 = vld [vmem:[#allocation13 + $0x20] sm:$0xff] }
 0x249   : > { %v1679_v18 = vmul.f32 %v1677_v58, %v4509_v48  ;;  %v1732_v4 = vsel %vm1193_vm6, %v1729_v56, %v1731_v61  ;;  %v1733_v10 = vsel %vm1193_vm6, %v1731_v61, %v1729_v56  ;;  %1646 = vmatpush.msra.mxu2 %v4362_v1  ;;  %v1680_v12 = vmul.f32 %v1678_v59, %v4511_v49 }
 0x24a   : > { %1599 = vmatpush.msra.mxu0 %v4583_v27  ;;  %1619 = vmatpush.msra.mxu1 %v4586_v28  ;;  %v1734_v19 = vmul.f32 %v1732_v4, %v4614_v45  ;;  %v1735_v20 = vmul.f32 %v1733_v10, %v4616_v46 }
 0x24b   : > { %1666 = vmatpush.msra.mxu3 %v4374_v3  ;;  %3444 = vmatmul.msk.f32.vlgmr.msra.gmra.mxu0 %vm1427_vm11, %v1580_v62 }
 0x24c   : > { %v1736_v23 = vmul.f32 %v1734_v19, %v4454_v21  ;;  %v1737_v30 = vmul.f32 %v1735_v20, %v4456_v22  ;;  %3445 = vmatmul.msk.f32.vlgmr.msra.gmra.mxu1 %vm1427_vm11, %v1580_v62  ;;  %3446 = vmatmul.msk.f32.vlgmr.msra.gmra.mxu2 %vm1427_vm11, %v1627_v11  ;;  %v1914_v19 = vld [vmem:[%s5472_s11] sm:$0xff] }
 0x24d   : > { %3447 = vmatmul.msk.f32.vlgmr.msra.gmra.mxu3 %vm1427_vm11, %v1627_v11  ;;  %1699 = vmatpush.msrb.mxu0 %v1679_v18 }
 0x24e   : > { %1719 = vmatpush.msrb.mxu1 %v1680_v12  ;;  %1756 = vmatpush.msrb.mxu2 %v1736_v23 }
 0x24f   : > { %1700 = vmatpush.msrb.mxu0 %v4577_v25  ;;  %1776 = vmatpush.msrb.mxu3 %v1737_v30  ;;  %v1843_v27 = vpop.permute.xlu1 %1842 }
 0x250   : > { %1720 = vmatpush.msrb.mxu1 %v4580_v26  ;;  %1757 = vmatpush.msrb.mxu2 %v4636_v5  ;;  %v1841_v28 = vpop.permute.xlu0 %1840 }
 0x251   : > { %1701 = vmatpush.msrb.mxu0 %v4603_v38  ;;  %1777 = vmatpush.msrb.mxu3 %v4639_v7  ;;  %v1844_v36 = vsel %vm1330_vm8, %v1841_v28, %v1843_v27  ;;  %v1845_v37 = vsel %vm1330_vm8, %v1843_v27, %v1841_v28  ;;  %v1897_v38 = vld [vmem:[%s5470_s9] sm:$0xff] }
 0x252   : > { %1721 = vmatpush.msrb.mxu1 %v4606_v39  ;;  %v1846_v25 = vmul.f32 %v1844_v36, %v4614_v45  ;;  %v1847_v26 = vmul.f32 %v1845_v37, %v4616_v46  ;;  %1758 = vmatpush.msrb.mxu2 %v4644_v15  ;;  %v1786_v39 = vpop.permute.xlu2 %1785 }
 0x253   : > { %1778 = vmatpush.msrb.mxu3 %v4647_v16  ;;  %3448 = vmatmul.msk.f32.vlgmr.msrb.gmra.mxu0 %vm1427_vm11, %v1682_v31 }
 0x254   : > { %v1848_v5 = vmul.f32 %v1846_v25, %v4509_v48  ;;  %v1849_v7 = vmul.f32 %v1847_v26, %v4511_v49  ;;  %3449 = vmatmul.msk.f32.vlgmr.msrb.gmra.mxu1 %vm1427_vm11, %v1682_v31  ;;  %3450 = vmatmul.msk.f32.vlgmr.msrb.gmra.mxu2 %vm1427_vm11, %v1739_v40 }
 0x255   : > { %3451 = vmatmul.msk.f32.vlgmr.msrb.gmra.mxu3 %vm1427_vm11, %v1739_v40  ;;  %1900 = vperm.xlu1 %3665, %v1897_v38  }
 0x256   : > { %1868 = vmatpush.msra.mxu2 %v1848_v5  ;;  %1888 = vmatpush.msra.mxu3 %v1849_v7 }
 0x257   : > { %1918 = vperm.xlu0 %3666, %v1914_v19  }
 0x258   : > { %1869 = vmatpush.msra.mxu2 %v4690_v54  ;;  %1889 = vmatpush.msra.mxu3 %v4693_v55  ;;  %v1788_v15 = vpop.permute.xlu0 %1787  ;;  %v5542_v54 = vld [vmem:[#allocation27_spill] sm:$0xff]  ;;  %v5543_v55 = vld [vmem:[#allocation28_spill] sm:$0xff] }
 0x259   : > { %v1789_v16 = vsel %vm1266_vm7, %v1786_v39, %v1788_v15  ;;  %v1790_v13 = vsel %vm1266_vm7, %v1788_v15, %v1786_v39  ;;  %v1907_v15 = vstv %s3437_s4  ;;  %s5557_s4 = sld [smem:[#allocation49_spill]] }
 0x25a   : > { %v1791_v14 = vmul.f32 %v1789_v16, %v4614_v45  ;;  %v1792_v43 = vmul.f32 %v1790_v13, %v4616_v46  ;;  %1870 = vmatpush.msra.mxu2 %v5540_v44  ;;  %1890 = vmatpush.msra.mxu3 %v5541_v51 }
 0x25c   : > { %1811 = vmatpush.msra.mxu0 %v1791_v14  ;;  %1831 = vmatpush.msra.mxu1 %v1792_v43 }
 0x25d   : > { %3454 = vmatmul.msk.f32.vlgmr.msra.gmra.mxu2 %vm1427_vm11, %v1851_v41  ;;  %3455 = vmatmul.msk.f32.vlgmr.msra.gmra.mxu3 %vm1427_vm11, %v1851_v41  ;;  %v1912_v41 = vld [vmem:[%s5471_s10] sm:$0xff] }
 0x25e   : > { %1812 = vmatpush.msra.mxu0 %v5542_v54  ;;  %1832 = vmatpush.msra.mxu1 %v5543_v55 }
 0x260   : > { %1813 = vmatpush.msra.mxu0 %v5544_v52  ;;  %1833 = vmatpush.msra.mxu1 %v5545_v53  ;;  %v1924_v53 = vpop.permute.xlu2 %1923 }
 0x261   : > { %3452 = vmatmul.msk.f32.vlgmr.msra.gmra.mxu0 %vm1427_vm11, %v1794_v42  ;;  %3453 = vmatmul.msk.f32.vlgmr.msra.gmra.mxu1 %vm1427_vm11, %v1794_v42 }
 0x2bc   : > { %v1448_v56 = vpop.f32.mrf.mxu2 }
 0x2bd   : > { %v1468_v57 = vpop.f32.mrf.mxu3 }
 0x2c0   : > { %v1491_v50 = vpop.f32.mrf.mxu0  ;;  %v1511_v24 = vpop.f32.mrf.mxu1 }
 0x2c1   : > { %v1512_v17 = vadd.f32 %v1511_v24, %v1468_v57  ;;  %v1492_v34 = vadd.f32 %v1491_v50, %v1448_v56  ;;  %v3668_v57 = vld [vmem:[%s4332_s19 + $0x10] sm:$0xff] }
 0x2c7   : > { %v1546_v29 = vpop.f32.mrf.mxu2  ;;  %v1566_v47 = vpop.f32.mrf.mxu3 }
 0x2c8   : > { %v1601_v32 = vpop.f32.mrf.mxu0  ;;  %v1570_v35 = vadd.f32 %v1566_v47, %v1512_v17  ;;  %v1569_v61 = vadd.f32 %v1546_v29, %v1492_v34  ;;  %v1901_v26 = vpop.permute.xlu1 %1900  ;;  %v3669_v47 = vld [vmem:[%s4332_s19 + $0x18] sm:$0xff] }
 0x2c9   : > { %v1621_v33 = vpop.f32.mrf.mxu1 }
 0x2ca   : > { %v1625_v62 = vadd.f32 %v1621_v33, %v1570_v35  ;;  %v1624_v18 = vadd.f32 %v1601_v32, %v1569_v61  ;;  %v2546_v32 = vld [vmem:[%s5546_s29] sm:$0xff]  ;;  %s787_s29 = scalar_lea.vmem [#allocation19], %s3400_s14 }
 0x2cf   : > { %v1648_v58 = vpop.f32.mrf.mxu2 }
 0x2d0   : > { %v1668_v59 = vpop.f32.mrf.mxu3  ;;  %v1703_v4 = vpop.f32.mrf.mxu0  ;;  %v1671_v11 = vadd.f32 %v1648_v58, %v1624_v18 }
 0x2d1   : > { %v1723_v10 = vpop.f32.mrf.mxu1  ;;  %v1672_v12 = vadd.f32 %v1668_v59, %v1625_v62 }
 0x2d2   : > { %v1726_v30 = vadd.f32 %v1703_v4, %v1671_v11 }
 0x2d3   : > { %v1727_v27 = vadd.f32 %v1723_v10, %v1672_v12 }
 0x2d7   : > { %v1760_v20 = vpop.f32.mrf.mxu2 }
 0x2d8   : > { %v1780_v23 = vpop.f32.mrf.mxu3  ;;  %v1783_v28 = vadd.f32 %v1760_v20, %v1726_v30 }
 0x2d9   : > { %v1784_v31 = vadd.f32 %v1780_v23, %v1727_v27 }
 0x2de   : > { %v1815_v36 = vpop.f32.mrf.mxu0  ;;  %v1835_v37 = vpop.f32.mrf.mxu1 }
 0x2df   : > { %v1838_v40 = vadd.f32 %v1815_v36, %v1783_v28  ;;  %v1839_v25 = vadd.f32 %v1835_v37, %v1784_v31 }
 0x2e0   : > { %v1872_v38 = vpop.f32.mrf.mxu2  ;;  %v1892_v5 = vpop.f32.mrf.mxu3 }
 0x2e1   : > { %v1895_v7 = vadd.f32 %v1872_v38, %v1838_v40  ;;  %v1896_v39 = vadd.f32 %v1892_v5, %v1839_v25 }
 0x2e3   : > { %v1903_v16 = vadd.f32 %v1901_v26, %v1895_v7  ;;  %v1904_v13 = vadd.f32 %v1901_v26, %v1896_v39 }
 0x2e5   : > { %v1908_v14 = vmul.f32 %v1907_v15, %v1903_v16  ;;  %v1909_v43 = vmul.f32 %v1907_v15, %v1904_v13  ;;  %vm1905_vm12 = vcmp.ge.f32.partialorder %v1903_v16, 0.0  ;;  %vm1906_vm13 = vcmp.ge.f32.partialorder %v1904_v13, 0.0  ;;  %v2022_v15 = vld [vmem:[#allocation15 + $0x8] sm:$0xff] }
 0x2e7   : > { %v1910_v44 = vsel %vm1905_vm12, %v1903_v16, %v1908_v14  ;;  %v1911_v51 = vsel %vm1906_vm13, %v1904_v13, %v1909_v43 }
 0x2e8   : > { %1945 = vmatpush.msrb.mxu0 %v1910_v44  ;;  %1968 = vmatpush.msrb.mxu1 %v1911_v51 }
 0x2ea   : > { %1946 = vmatpush.msrb.mxu0 %v4720_v60  ;;  %1969 = vmatpush.msrb.mxu1 %v4722_v63 }
 0x2ec   : > { %1947 = vmatpush.msrb.mxu0 %v4359_v0  ;;  %1970 = vmatpush.msrb.mxu1 %v4371_v2  ;;  %v1913_v0 = vld [vmem:[%s5471_s10 + $0x8] sm:$0xff]  ;;  %v1919_v2 = vpop.permute.xlu0 %1918 }
 0x2ee   : > { %1948 = vmatpush.msrb.mxu0 %v4362_v1  ;;  %1971 = vmatpush.msrb.mxu1 %v4374_v3  ;;  %v3667_v1 = vld [vmem:[%s4332_s19] sm:$0xff]  ;;  %s5556_s19 = sld [smem:[#allocation45_spill]] }
 0x2ef   : > { %3456 = vmatmul.msk.f32.vlgmr.msrb.gmra.mxu0 %vm1926_vm14, %v1912_v41  ;;  %3458 = vmatmul.msk.f32.vlgmr.msrb.gmra.mxu1 %vm1926_vm14, %v1912_v41 }
 0x2f7   : > { %3457 = vmatmul.msk.f32.gmra.mxu0 %vm1926_vm14, %v1913_v0  ;;  %3459 = vmatmul.msk.f32.gmra.mxu1 %vm1926_vm14, %v1913_v0 }
 0x36c   : > { %v1950_v60 = vpop.f32.mrf.mxu0  ;;  %v1973_v63 = vpop.f32.mrf.mxu1 }
 0x36d   : > { %v1951_v54 = vadd.f32 %v1950_v60, %v1919_v2  ;;  %v1974_v55 = vadd.f32 %v1973_v63, %v1919_v2 }
 0x36f   : > { %v4894_v42 = vadd.f32 %v3667_v1, %v1951_v54  ;;  %v4897_v52 = vadd.f32 %v1974_v55, %v4374_v3 }
 0x371   : > { %1988 = vrot.lane.b32.xlu0 %v4897_v52, %s4056_s5  ;;  %2009 = vrot.lane.b32.xlu2 %v4897_v52, %s4057_s12 }
 0x372   : > { %2005 = vrot.lane.b32.xlu1 %v4894_v42, %s4057_s12 }
 0x374   : > { %v1953_v3 = vpop.f32.mrf.mxu0  ;;  %v1976_v24 = vpop.f32.mrf.mxu1 }
 0x375   : > { %v1954_v56 = vadd.f32 %v1953_v3, %v1924_v53  ;;  %v1977_v29 = vadd.f32 %v1976_v24, %v1924_v53 }
 0x377   : > { %v4924_v50 = vadd.f32 %v3668_v57, %v1954_v56  ;;  %v4933_v17 = vadd.f32 %v3669_v47, %v1977_v29  ;;  %v2004_v29 = vld [vmem:[#allocation15] sm:$0xff] }
 0x379   : > { %2109 = vrot.lane.b32.xlu0 %v4894_v42, %s4058_s28  ;;  %1984 = vrot.lane.b32.xlu2 %v4894_v42, %s4056_s5 }
 0x37a   : > { %2113 = vrot.lane.b32.xlu1 %v4897_v52, %s4058_s28 }
 0x381   : > { %2290 = vrot.lane.b32.xlu0 %v4897_v52, %s4060_s26  ;;  %2180 = vrot.lane.b32.xlu2 %v4897_v52, %s4059_s13 }
 0x382   : > { %2176 = vrot.lane.b32.xlu1 %v4894_v42, %s4059_s13 }
 0x389   : > { %2349 = vrot.lane.b32.xlu0 %v4894_v42, %s4061_s2  ;;  %2286 = vrot.lane.b32.xlu2 %v4894_v42, %s4060_s26 }
 0x38a   : > { %2353 = vrot.lane.b32.xlu1 %v4897_v52, %s4061_s2 }
 0x391   : > { %1986 = vrot.lane.b32.xlu0 %v4924_v50, %s4056_s5  ;;  %2420 = vrot.lane.b32.xlu2 %v4897_v52, %s4062_s8 }
 0x392   : > { %2416 = vrot.lane.b32.xlu1 %v4894_v42, %s4062_s8 }
 0x399   : > { %2182 = vrot.lane.b32.xlu0 %v4933_v17, %s4059_s13  ;;  %2011 = vrot.lane.b32.xlu2 %v4933_v17, %s4057_s12 }
 0x39a   : > { %2007 = vrot.lane.b32.xlu1 %v4924_v50, %s4057_s12 }
 0x3a1   : > { %2288 = vrot.lane.b32.xlu0 %v4924_v50, %s4060_s26  ;;  %2115 = vrot.lane.b32.xlu2 %v4933_v17, %s4058_s28 }
 0x3a2   : > { %1990 = vrot.lane.b32.xlu1 %v4933_v17, %s4056_s5 }
 0x3a9   : > { %2422 = vrot.lane.b32.xlu0 %v4933_v17, %s4062_s8  ;;  %2178 = vrot.lane.b32.xlu2 %v4924_v50, %s4059_s13 }
 0x3aa   : > { %2111 = vrot.lane.b32.xlu1 %v4924_v50, %s4058_s28 }
 0x3b1   : > { %2481 = vrot.lane.b32.xlu0 %v4924_v50, %s4063_s0  ;;  %2355 = vrot.lane.b32.xlu2 %v4933_v17, %s4061_s2 }
 0x3b2   : > { %2292 = vrot.lane.b32.xlu1 %v4933_v17, %s4060_s26 }
 0x3b9   : > { %2483 = vrot.lane.b32.xlu0 %v4897_v52, %s4063_s0  ;;  %2418 = vrot.lane.b32.xlu2 %v4924_v50, %s4062_s8 }
 0x3ba   : > { %2351 = vrot.lane.b32.xlu1 %v4924_v50, %s4061_s2 }
 0x3c1   : > { %2479 = vrot.lane.b32.xlu2 %v4894_v42, %s4063_s0 }
 0x3c2   : > { %2485 = vrot.lane.b32.xlu1 %v4933_v17, %s4063_s0 }
 0x3ca   : > { %2549 = vperm.xlu1 %3665, %v2546_v32  }
 0x3cb   : > { %v2010_v33 = vpop.permute.xlu2 %2009 }
 0x3d3   : > { %v1985_v34 = vpop.permute.xlu2 %1984 }
 0x3db   : > { %v2181_v35 = vpop.permute.xlu2 %2180 }
 0x3e3   : > { %v1989_v58 = vpop.permute.xlu0 %1988  ;;  %v4972_v61 = vpop.permute.xlu2 %2286 }
 0x3e4   : > { %v2006_v59 = vpop.permute.xlu1 %2005  ;;  %v1994_v16 = vsel %vm807_vm1, %v1989_v58, %v1985_v34  ;;  %v1992_v13 = vsel %vm807_vm1, %v1985_v34, %v1989_v58 }
 0x3e5   : > { %v2013_v36 = vsel %vm839_vm0, %v2006_v59, %v2010_v33  ;;  %v2015_v37 = vsel %vm839_vm0, %v2010_v33, %v2006_v59  ;;  %v1996_v44 = vmul.f32 %v1994_v16, %v4437_v8  ;;  %v1997_v0 = vmul.f32 %v1992_v13, %v4439_v9 }
 0x3e6   : > { %v4999_v5 = vmul.f32 %v2015_v37, %v4437_v8  ;;  %v5002_v7 = vmul.f32 %v2013_v36, %v4439_v9 }
 0x3e7   : > { %v5033_v3 = vmul.f32 %v1996_v44, %v4454_v21  ;;  %v5044_v24 = vmul.f32 %v1997_v0, %v4456_v22 }
 0x3eb   : > { %v2110_v62 = vpop.permute.xlu0 %2109  ;;  %v4974_v4 = vpop.permute.xlu2 %2420 }
 0x3ec   : > { %v2114_v18 = vpop.permute.xlu1 %2113 }
 0x3ed   : > { %v2119_v55 = vsel %vm945_vm3, %v2114_v18, %v2110_v62  ;;  %v2117_v53 = vsel %vm945_vm3, %v2110_v62, %v2114_v18 }
 0x3ee   : > { %v2121_v33 = vmul.f32 %v2119_v55, %v4437_v8  ;;  %v2122_v62 = vmul.f32 %v2117_v53, %v4439_v9 }
 0x3f0   : > { %v5087_v37 = vmul.f32 %v2121_v33, %v4509_v48 }
 0x3f3   : > { %v4976_v10 = vpop.permute.xlu0 %2290  ;;  %v2012_v19 = vpop.permute.xlu2 %2011 }
 0x3f4   : > { %v2177_v11 = vpop.permute.xlu1 %2176  ;;  %v2296_v16 = vsel %vm1129_vm5, %v4976_v10, %v4972_v61 }
 0x3f5   : > { %v2186_v47 = vsel %vm1018_vm4, %v2181_v35, %v2177_v11  ;;  %v2184_v34 = vsel %vm1018_vm4, %v2177_v11, %v2181_v35 }
 0x3f6   : > { %v5066_v35 = vmul.f32 %v2186_v47, %v4454_v21  ;;  %v2240_v47 = vld [vmem:[#allocation15 + $0x20] sm:$0xff] }
 0x3fb   : > { %v4978_v12 = vpop.permute.xlu0 %2349  ;;  %v2116_v27 = vpop.permute.xlu2 %2115 }
 0x3fc   : > { %v4980_v20 = vpop.permute.xlu1 %2353 }
 0x3fd   : > { %v2357_v55 = vsel %vm1193_vm6, %v4978_v12, %v4980_v20 }
 0x403   : > { %v1987_v23 = vpop.permute.xlu0 %1986  ;;  %v2179_v39 = vpop.permute.xlu2 %2178 }
 0x404   : > { %v4982_v30 = vpop.permute.xlu1 %2416 }
 0x40b   : > { %v2183_v28 = vpop.permute.xlu0 %2182  ;;  %v5039_v57 = vpop.permute.xlu2 %2355 }
 0x40c   : > { %v2008_v31 = vpop.permute.xlu1 %2007  ;;  %v2187_v1 = vsel %vm1018_vm4, %v2183_v28, %v2179_v39  ;;  %v2185_v56 = vsel %vm1018_vm4, %v2179_v39, %v2183_v28  ;;  %v2193_v39 = vld [vmem:[#allocation15 + $0x18] sm:$0xff] }
 0x40d   : > { %v2014_v40 = vsel %vm839_vm0, %v2008_v31, %v2012_v19  ;;  %v2016_v25 = vsel %vm839_vm0, %v2012_v19, %v2008_v31  ;;  %v5052_v58 = vmul.f32 %v2187_v1, %v4454_v21  ;;  %v5058_v18 = vmul.f32 %v2185_v56, %v4456_v22 }
 0x40e   : > { %v4993_v26 = vmul.f32 %v2016_v25, %v4437_v8  ;;  %v4996_v38 = vmul.f32 %v2014_v40, %v4439_v9  ;;  %v5073_v31 = vmul.f32 %v2184_v34, %v4456_v22  ;;  %v5090_v40 = vmul.f32 %v2122_v62, %v4511_v49  ;;  %v2130_v25 = vld [vmem:[#allocation15 + $0x10] sm:$0xff] }
 0x40f   : > { %v2359_v56 = vsel %vm1193_vm6, %v4980_v20, %v4978_v12  ;;  %v2303_v12 = vld [vmem:[#allocation15 + $0x28] sm:$0xff]  ;;  %v2361_v20 = vmul.f32 %v2357_v55, %v4614_v45 }
 0x410   : > { %2040 = vmatpush.msrb.mxu2 %v4993_v26  ;;  %2060 = vmatpush.msrb.mxu3 %v4996_v38  ;;  %v2362_v34 = vmul.f32 %v2359_v56, %v4616_v46 }
 0x412   : > { %2041 = vmatpush.msrb.mxu2 %v4999_v5  ;;  %2061 = vmatpush.msrb.mxu3 %v5002_v7 }
 0x413   : > { %v2289_v14 = vpop.permute.xlu0 %2288  ;;  %3461 = vmatmul.msk.f32.vlgmr.msrb.gmra.mxu2 %vm850_vm2, %v2022_v15  ;;  %3462 = vmatmul.msk.f32.vlgmr.msrb.gmra.mxu3 %vm850_vm2, %v2022_v15  ;;  %v2294_v15 = vsel %vm1129_vm5, %v4972_v61, %v4976_v10  ;;  %v2419_v13 = vpop.permute.xlu2 %2418 }
 0x414   : > { %v1991_v43 = vpop.permute.xlu1 %1990 }
 0x415   : > { %v1993_v51 = vsel %vm807_vm1, %v1987_v23, %v1991_v43  ;;  %v1995_v41 = vsel %vm807_vm1, %v1991_v43, %v1987_v23 }
 0x416   : > { %v1998_v2 = vmul.f32 %v1995_v41, %v4437_v8  ;;  %v1999_v60 = vmul.f32 %v1993_v51, %v4439_v9 }
 0x418   : > { %v5023_v63 = vmul.f32 %v1998_v2, %v4454_v21  ;;  %v5026_v54 = vmul.f32 %v1999_v60, %v4456_v22  ;;  %v5128_v60 = vmul.f32 %v2296_v16, %v4511_v49  ;;  %v5196_v16 = vmul.f32 %v2362_v34, %v4456_v22 }
 0x41a   : > { %2083 = vmatpush.msra.mxu2 %v5023_v63  ;;  %2103 = vmatpush.msra.mxu3 %v5026_v54 }
 0x41b   : > { %v2423_v32 = vpop.permute.xlu0 %2422 }
 0x41c   : > { %2084 = vmatpush.msra.mxu2 %v5033_v3  ;;  %2104 = vmatpush.msra.mxu3 %v5044_v24  ;;  %v2112_v59 = vpop.permute.xlu1 %2111  ;;  %v2425_v44 = vsel %vm1266_vm7, %v2419_v13, %v2423_v32  ;;  %v2427_v61 = vsel %vm1266_vm7, %v2423_v32, %v2419_v13  ;;  %v2426_v32 = vsel %vm1266_vm7, %v4974_v4, %v4982_v30  ;;  %v2370_v13 = vld [vmem:[#allocation15 + $0x30] sm:$0xff] }
 0x41d   : > { %v2118_v19 = vsel %vm945_vm3, %v2112_v59, %v2116_v27  ;;  %v2120_v23 = vsel %vm945_vm3, %v2116_v27, %v2112_v59  ;;  %3463 = vmatmul.msk.f32.vlgmr.msra.gmra.mxu2 %vm850_vm2, %v2004_v29  ;;  %3464 = vmatmul.msk.f32.vlgmr.msra.gmra.mxu3 %vm850_vm2, %v2004_v29  ;;  %v5137_v1 = vmul.f32 %v2425_v44, %v4614_v45  ;;  %v2433_v44 = vld [vmem:[#allocation15 + $0x38] sm:$0xff] }
 0x41e   : > { %v2123_v11 = vmul.f32 %v2120_v23, %v4437_v8  ;;  %v2124_v28 = vmul.f32 %v2118_v19, %v4439_v9  ;;  %2211 = vmatpush.msrb.mxu2 %v5052_v58  ;;  %2231 = vmatpush.msrb.mxu3 %v5058_v18  ;;  %v5140_v53 = vmul.f32 %v2427_v61, %v4616_v46 }
 0x41f   : > { %5547 = vst [vmem:[#allocation31_spill] sm:$0xff] %v5137_v1  ;;  %v2424_v29 = vsel %vm1266_vm7, %v4982_v30, %v4974_v4  ;;  %v5173_v30 = vmul.f32 %v2426_v32, %v4616_v46 }
 0x420   : > { %v5077_v27 = vmul.f32 %v2123_v11, %v4509_v48  ;;  %v5080_v36 = vmul.f32 %v2124_v28, %v4511_v49  ;;  %2212 = vmatpush.msrb.mxu2 %v5066_v35  ;;  %2232 = vmatpush.msrb.mxu3 %v5073_v31  ;;  %5548 = vst [vmem:[#allocation32_spill] sm:$0xff] %v5140_v53 }
 0x421   : > { %v5163_v59 = vmul.f32 %v2424_v29, %v4614_v45  ;;  %5550 = vst [vmem:[#allocation28_spill] sm:$0xff] %v5173_v30 }
 0x422   : > { %2148 = vmatpush.msra.mxu0 %v5077_v27  ;;  %2168 = vmatpush.msra.mxu1 %v5080_v36 }
 0x423   : > { %v5104_v51 = vpop.permute.xlu0 %2481  ;;  %5549 = vst [vmem:[#allocation27_spill] sm:$0xff] %v5163_v59 }
 0x424   : > { %2149 = vmatpush.msra.mxu0 %v5087_v37  ;;  %2169 = vmatpush.msra.mxu1 %v5090_v40  ;;  %v2293_v43 = vpop.permute.xlu1 %2292 }
 0x425   : > { %v2295_v41 = vsel %vm1129_vm5, %v2289_v14, %v2293_v43  ;;  %v2297_v0 = vsel %vm1129_vm5, %v2293_v43, %v2289_v14  ;;  %3465 = vmatmul.msk.f32.vlgmr.msra.gmra.mxu0 %vm850_vm2, %v2130_v25  ;;  %3466 = vmatmul.msk.f32.vlgmr.msra.gmra.mxu1 %vm850_vm2, %v2130_v25  ;;  %v5125_v14 = vmul.f32 %v2294_v15, %v4509_v48  ;;  %v2480_v25 = vpop.permute.xlu2 %2479 }
 0x426   : > { %v5115_v10 = vmul.f32 %v2295_v41, %v4509_v48  ;;  %v5118_v2 = vmul.f32 %v2297_v0, %v4511_v49  ;;  %3467 = vmatmul.msk.f32.vlgmr.msrb.gmra.mxu2 %vm850_vm2, %v2193_v39  ;;  %3468 = vmatmul.msk.f32.vlgmr.msrb.gmra.mxu3 %vm850_vm2, %v2193_v39  ;;  %v5193_v15 = vmul.f32 %v2361_v20, %v4454_v21  ;;  %v5558_v6 = vld [vmem:[#allocation31_spill] sm:$0xff] }
 0x427   : > { %2258 = vmatpush.msrb.mxu0 %v4924_v50  ;;  %2278 = vmatpush.msrb.mxu1 %v4933_v17 }
 0x428   : > { %2321 = vmatpush.msra.mxu2 %v5115_v10  ;;  %2341 = vmatpush.msra.mxu3 %v5118_v2 }
 0x429   : > { %2259 = vmatpush.msrb.mxu0 %v4894_v42  ;;  %2279 = vmatpush.msrb.mxu1 %v4897_v52 }
 0x42a   : > { %2322 = vmatpush.msra.mxu2 %v5125_v14  ;;  %2342 = vmatpush.msra.mxu3 %v5128_v60 }
 0x42b   : > { %v2484_v11 = vpop.permute.xlu0 %2483 }
 0x42c   : > { %2451 = vmatpush.msrb.mxu2 %v5137_v1  ;;  %2471 = vmatpush.msrb.mxu3 %v5140_v53  ;;  %v2352_v33 = vpop.permute.xlu1 %2351  ;;  %v2487_v39 = vsel %vm1330_vm8, %v2480_v25, %v2484_v11  ;;  %v2489_v43 = vsel %vm1330_vm8, %v2484_v11, %v2480_v25 }
 0x42d   : > { %v2358_v62 = vsel %vm1193_vm6, %v2352_v33, %v5039_v57  ;;  %v2360_v4 = vsel %vm1193_vm6, %v5039_v57, %v2352_v33  ;;  %3469 = vmatmul.msk.f32.vlgmr.msrb.gmra.mxu0 %vm850_vm2, %v2240_v47  ;;  %3470 = vmatmul.msk.f32.vlgmr.msrb.gmra.mxu1 %vm850_vm2, %v2240_v47  ;;  %v2491_v0 = vmul.f32 %v2487_v39, %v4614_v45  ;;  %v2500_v33 = vld [vmem:[#allocation15 + $0x40] sm:$0xff] }
 0x42e   : > { %v2363_v19 = vmul.f32 %v2358_v62, %v4614_v45  ;;  %v2364_v23 = vmul.f32 %v2360_v4, %v4616_v46  ;;  %3471 = vmatmul.msk.f32.vlgmr.msra.gmra.mxu2 %vm850_vm2, %v2303_v12  ;;  %3472 = vmatmul.msk.f32.vlgmr.msra.gmra.mxu3 %vm850_vm2, %v2303_v12  ;;  %v2492_v56 = vmul.f32 %v2489_v43, %v4616_v46 }
 0x42f   : > { %2452 = vmatpush.msrb.mxu2 %v5163_v59  ;;  %2472 = vmatpush.msrb.mxu3 %v5173_v30 }
 0x430   : > { %v5182_v57 = vmul.f32 %v2363_v19, %v4454_v21  ;;  %v5185_v28 = vmul.f32 %v2364_v23, %v4456_v22  ;;  %v5228_v20 = vmul.f32 %v2492_v56, %v4511_v49 }
 0x432   : > { %2388 = vmatpush.msra.mxu0 %v5182_v57  ;;  %2408 = vmatpush.msra.mxu1 %v5185_v28  ;;  %5554 = vst [vmem:[#allocation34_spill] sm:$0xff] %v5228_v20 }
 0x434   : > { %2389 = vmatpush.msra.mxu0 %v5193_v15  ;;  %2409 = vmatpush.msra.mxu1 %v5196_v16  ;;  %v2486_v41 = vpop.permute.xlu1 %2485 }
 0x435   : > { %v2488_v61 = vsel %vm1330_vm8, %v5104_v51, %v2486_v41  ;;  %v2490_v55 = vsel %vm1330_vm8, %v2486_v41, %v5104_v51  ;;  %3473 = vmatmul.msk.f32.vlgmr.msra.gmra.mxu0 %vm850_vm2, %v2370_v13  ;;  %3474 = vmatmul.msk.f32.vlgmr.msra.gmra.mxu1 %vm850_vm2, %v2370_v13  ;;  %v5225_v51 = vmul.f32 %v2491_v0, %v4509_v48 }
 0x436   : > { %v2493_v29 = vmul.f32 %v2488_v61, %v4614_v45  ;;  %v2494_v47 = vmul.f32 %v2490_v55, %v4616_v46  ;;  %3475 = vmatmul.msk.f32.vlgmr.msrb.gmra.mxu2 %vm850_vm2, %v2433_v44  ;;  %3476 = vmatmul.msk.f32.vlgmr.msrb.gmra.mxu3 %vm850_vm2, %v2433_v44 }
 0x437   : > { %5553 = vst [vmem:[#allocation33_spill] sm:$0xff] %v5225_v51 }
 0x438   : > { %v5217_v32 = vmul.f32 %v2493_v29, %v4509_v48  ;;  %v5220_v12 = vmul.f32 %v2494_v47, %v4511_v49 }
 0x43a   : > { %5551 = vst [vmem:[#allocation29_spill] sm:$0xff] %v5217_v32  ;;  %2518 = vmatpush.msrb.mxu0 %v5217_v32  ;;  %2538 = vmatpush.msrb.mxu1 %v5220_v12 }
 0x43b   : > { %5552 = vst [vmem:[#allocation30_spill] sm:$0xff] %v5220_v12 }
 0x43c   : > { %2519 = vmatpush.msrb.mxu0 %v5225_v51  ;;  %2539 = vmatpush.msrb.mxu1 %v5228_v20 }
 0x43d   : > { %3477 = vmatmul.msk.f32.vlgmr.msrb.gmra.mxu0 %vm850_vm2, %v2500_v33  ;;  %3478 = vmatmul.msk.f32.vlgmr.msrb.gmra.mxu1 %vm850_vm2, %v2500_v33 }
 0x496   : > { %v2043_v34 = vpop.f32.mrf.mxu2  ;;  %v2063_v62 = vpop.f32.mrf.mxu3 }
 0x4a0   : > { %v2086_v4 = vpop.f32.mrf.mxu2  ;;  %v2106_v19 = vpop.f32.mrf.mxu3 }
 0x4a1   : > { %v2087_v25 = vadd.f32 %v2086_v4, %v2043_v34  ;;  %v2107_v39 = vadd.f32 %v2106_v19, %v2063_v62 }
 0x4a2   : > { %v2151_v23 = vpop.f32.mrf.mxu0  ;;  %v2171_v11 = vpop.f32.mrf.mxu1 }
 0x4a3   : > { %v2174_v0 = vadd.f32 %v2151_v23, %v2087_v25  ;;  %v2175_v61 = vadd.f32 %v2171_v11, %v2107_v39  ;;  %v2550_v25 = vpop.permute.xlu1 %2549  ;;  %v2556_v39 = vstv %s3460_s16 }
 0x4a9   : > { %v2214_v13 = vpop.f32.mrf.mxu2  ;;  %v2234_v43 = vpop.f32.mrf.mxu3 }
 0x4aa   : > { %v2261_v44 = vpop.f32.mrf.mxu0  ;;  %v2281_v41 = vpop.f32.mrf.mxu1  ;;  %v2237_v55 = vadd.f32 %v2214_v13, %v2174_v0  ;;  %v2238_v56 = vadd.f32 %v2234_v43, %v2175_v61 }
 0x4ac   : > { %v2284_v47 = vadd.f32 %v2261_v44, %v2237_v55  ;;  %v2285_v51 = vadd.f32 %v2281_v41, %v2238_v56 }
 0x4b1   : > { %v2324_v29 = vpop.f32.mrf.mxu2  ;;  %v2344_v20 = vpop.f32.mrf.mxu3 }
 0x4b2   : > { %v2391_v33 = vpop.f32.mrf.mxu0  ;;  %v2411_v12 = vpop.f32.mrf.mxu1  ;;  %v2347_v32 = vadd.f32 %v2324_v29, %v2284_v47  ;;  %v2348_v30 = vadd.f32 %v2344_v20, %v2285_v51 }
 0x4b4   : > { %v2414_v59 = vadd.f32 %v2391_v33, %v2347_v32  ;;  %v2415_v34 = vadd.f32 %v2411_v12, %v2348_v30  ;;  %v3139_v12 = vld [vmem:[%s5557_s4] sm:$0xff] }
 0x4b9   : > { %v2454_v62 = vpop.f32.mrf.mxu2  ;;  %v2474_v19 = vpop.f32.mrf.mxu3 }
 0x4ba   : > { %v2477_v4 = vadd.f32 %v2454_v62, %v2414_v59  ;;  %v2521_v53 = vpop.f32.mrf.mxu0  ;;  %v2478_v1 = vadd.f32 %v2474_v19, %v2415_v34  ;;  %v2541_v23 = vpop.f32.mrf.mxu1  ;;  %v3140_v59 = vld [vmem:[%s5557_s4 + $0x8] sm:$0xff] }
 0x4bc   : > { %v2544_v11 = vadd.f32 %v2521_v53, %v2477_v4  ;;  %v2545_v13 = vadd.f32 %v2541_v23, %v2478_v1  ;;  %v3052_v53 = vld [vmem:[%s5556_s19] sm:$0xff] }
 0x4be   : > { %v2552_v43 = vadd.f32 %v2550_v25, %v2544_v11  ;;  %v2553_v44 = vadd.f32 %v2550_v25, %v2545_v13  ;;  %v2582_v25 = vld [vmem:[#allocation16 + $0x8] sm:$0xff] }
 0x4c0   : > { %vm2554_vm15 = vcmp.ge.f32.partialorder %v2552_v43, 0.0  ;;  %v2557_v41 = vmul.f32 %v2556_v39, %v2552_v43  ;;  %vm2555_vm2 = vcmp.ge.f32.partialorder %v2553_v44, 0.0  ;;  %v2558_v0 = vmul.f32 %v2556_v39, %v2553_v44 }
 0x4c2   : > { %v5234_v51 = vsel %vm2554_vm15, %v2552_v43, %v2557_v41  ;;  %v5236_v32 = vsel %vm2555_vm2, %v2553_v44, %v2558_v0 }
 0x4c3   : > { %2669 = vrot.lane.b32.xlu1 %v5234_v51, %s4058_s28  ;;  %2573 = vrot.lane.b32.xlu2 %v5234_v51, %s4057_s12 }
 0x4c4   : > { %2575 = vrot.lane.b32.xlu0 %v5236_v32, %s4057_s12 }
 0x4cb   : > { %2564 = vrot.lane.b32.xlu1 %v5236_v32, %s4056_s5  ;;  %2671 = vrot.lane.b32.xlu2 %v5236_v32, %s4058_s28  ;;  %s3220_s28 = sshll.u32 %s787_s29, 4  ;;  %s3221_s28 = int_to_ptr.vmem [resolvable:$true] %s3220_s28 }
 0x4cc   : > { %2562 = vrot.lane.b32.xlu0 %v5234_v51, %s4056_s5  ;;  %s5567_s5 = sld [smem:[#allocation50_spill]] }
 0x4d2   : > { %s3975_s16 = scalar_lea.hbm %s5567_s5, 64 }
 0x4d3   : > { %2883 = vrot.lane.b32.xlu1 %v5234_v51, %s4061_s2  ;;  %2726 = vrot.lane.b32.xlu2 %v5234_v51, %s4059_s13 }
 0x4d4   : > { %2728 = vrot.lane.b32.xlu0 %v5236_v32, %s4059_s13  ;;  %s5555_s13 = sld [smem:[#allocation47_spill]] }
 0x4da   : > { %v3070_v1 = vld [vmem:[%s5555_s13 + $0x8] sm:$0xff]  ;;  %v3069_v30 = vld [vmem:[%s5555_s13] sm:$0xff] }
 0x4db   : > { %2830 = vrot.lane.b32.xlu1 %v5236_v32, %s4060_s26  ;;  %2885 = vrot.lane.b32.xlu2 %v5236_v32, %s4061_s2  ;;  %s3512_s2 = sshll.u32 %s4195_s27, 5  ;;  %s3208_s27 = scalar_lea.sflag [#allocation4], %s4326_s30 }
 0x4dc   : > { %2828 = vrot.lane.b32.xlu0 %v5234_v51, %s4060_s26 }
 0x4e3   : > { %2940 = vrot.lane.b32.xlu1 %v5234_v51, %s4062_s8  ;;  %2995 = vrot.lane.b32.xlu2 %v5234_v51, %s4063_s0 }
 0x4e4   : > { %2997 = vrot.lane.b32.xlu0 %v5236_v32, %s4063_s0 }
 0x4eb   : > { %3078 = vperm.xlu1 %3665, %v3070_v1   ;;  %2942 = vrot.lane.b32.xlu2 %v5236_v32, %s4062_s8  ;;  %s3479_s8 = sld [smem:[#allocation6 + $0x3]] }
 0x4ec   : > { %3055 = vperm.xlu0 %3666, %v3052_v53  }
 0x4f3   : > { %3148 = vperm.xlu1 %3665, %v3140_v59   ;;  %3073 = vperm.xlu2 %3664, %v3069_v30   ;;  %v2680_v59 = vld [vmem:[#allocation16 + $0x10] sm:$0xff] }
 0x4f4   : > { %3143 = vperm.xlu0 %3666, %v3139_v12  }
 0x51d   : > { %v2574_v20 = vpop.permute.xlu2 %2573 }
 0x525   : > { %v2672_v61 = vpop.permute.xlu2 %2671 }
 0x52d   : > { %v2727_v29 = vpop.permute.xlu2 %2726 }
 0x535   : > { %v2670_v55 = vpop.permute.xlu1 %2669  ;;  %v2886_v1 = vpop.permute.xlu2 %2885 }
 0x536   : > { %v2576_v56 = vpop.permute.xlu0 %2575  ;;  %v2673_v34 = vsel %vm945_vm3, %v2670_v55, %v2672_v61  ;;  %v2674_v62 = vsel %vm945_vm3, %v2672_v61, %v2670_v55  ;;  %v2572_v61 = vld [vmem:[#allocation16] sm:$0xff] }
 0x537   : > { %v2577_v47 = vsel %vm839_vm0, %v2574_v20, %v2576_v56  ;;  %v2578_v33 = vsel %vm839_vm0, %v2576_v56, %v2574_v20  ;;  %v2675_v23 = vmul.f32 %v2674_v62, %v4437_v8  ;;  %v2676_v11 = vmul.f32 %v2673_v34, %v4439_v9  ;;  %v2894_v34 = vld [vmem:[#allocation16 + $0x30] sm:$0xff] }
 0x538   : > { %v2579_v4 = vmul.f32 %v2578_v33, %v4437_v8  ;;  %v2580_v19 = vmul.f32 %v2577_v47, %v4439_v9 }
 0x539   : > { %v2677_v13 = vmul.f32 %v2675_v23, %v4509_v48  ;;  %v2678_v43 = vmul.f32 %v2676_v11, %v4511_v49  ;;  %v2949_v11 = vld [vmem:[#allocation16 + $0x38] sm:$0xff] }
 0x53a   : > { %2599 = vmatpush.msra.mxu2 %v2579_v4  ;;  %2619 = vmatpush.msra.mxu3 %v2580_v19 }
 0x53c   : > { %2600 = vmatpush.msra.mxu2 %v4993_v26  ;;  %2620 = vmatpush.msra.mxu3 %v4996_v38 }
 0x53d   : > { %v2565_v39 = vpop.permute.xlu1 %2564  ;;  %v2996_v55 = vpop.permute.xlu2 %2995 }
 0x53e   : > { %v2563_v44 = vpop.permute.xlu0 %2562  ;;  %2601 = vmatpush.msra.mxu2 %v4999_v5  ;;  %2621 = vmatpush.msra.mxu3 %v5002_v7 }
 0x53f   : > { %v2566_v41 = vsel %vm807_vm1, %v2563_v44, %v2565_v39  ;;  %v2567_v0 = vsel %vm807_vm1, %v2565_v39, %v2563_v44  ;;  %3480 = vmatmul.msk.f32.vlgmr.msra.gmra.mxu2 %vm1427_vm11, %v2582_v25  ;;  %3481 = vmatmul.msk.f32.vlgmr.msra.gmra.mxu3 %vm1427_vm11, %v2582_v25  ;;  %v5564_v25 = vld [vmem:[#allocation33_spill] sm:$0xff]  ;;  %v5565_v39 = vld [vmem:[#allocation34_spill] sm:$0xff] }
 0x540   : > { %v2568_v26 = vmul.f32 %v2567_v0, %v4437_v8  ;;  %v2569_v38 = vmul.f32 %v2566_v41, %v4439_v9  ;;  %2697 = vmatpush.msrb.mxu2 %v2677_v13  ;;  %2717 = vmatpush.msrb.mxu3 %v2678_v43 }
 0x542   : > { %v2570_v5 = vmul.f32 %v2568_v26, %v4454_v21  ;;  %v2571_v7 = vmul.f32 %v2569_v38, %v4456_v22  ;;  %2698 = vmatpush.msrb.mxu2 %v5077_v27  ;;  %2718 = vmatpush.msrb.mxu3 %v5080_v36 }
 0x544   : > { %2699 = vmatpush.msrb.mxu2 %v5087_v37  ;;  %2719 = vmatpush.msrb.mxu3 %v5090_v40 }
 0x545   : > { %2642 = vmatpush.msra.mxu0 %v2570_v5  ;;  %2662 = vmatpush.msra.mxu1 %v2571_v7  ;;  %v2884_v8 = vpop.permute.xlu1 %2883 }
 0x546   : > { %2799 = vmatpush.msra.mxu2 %v5234_v51  ;;  %2819 = vmatpush.msra.mxu3 %v5236_v32  ;;  %v2729_v9 = vpop.permute.xlu0 %2728  ;;  %v2887_v53 = vsel %vm1193_vm6, %v2884_v8, %v2886_v1  ;;  %v2888_v27 = vsel %vm1193_vm6, %v2886_v1, %v2884_v8 }
 0x547   : > { %v2730_v36 = vsel %vm1018_vm4, %v2727_v29, %v2729_v9  ;;  %v2731_v37 = vsel %vm1018_vm4, %v2729_v9, %v2727_v29  ;;  %2643 = vmatpush.msra.mxu0 %v5023_v63  ;;  %2663 = vmatpush.msra.mxu1 %v5026_v54  ;;  %v2889_v40 = vmul.f32 %v2887_v53, %v4614_v45 }
 0x548   : > { %v2890_v30 = vmul.f32 %v2888_v27, %v4616_v46  ;;  %2800 = vmatpush.msra.mxu2 %v4924_v50  ;;  %2820 = vmatpush.msra.mxu3 %v4933_v17  ;;  %v2732_v12 = vmul.f32 %v2731_v37, %v4454_v21  ;;  %v2733_v20 = vmul.f32 %v2730_v36, %v4456_v22 }
 0x549   : > { %3484 = vmatmul.msk.f32.vlgmr.msrb.gmra.mxu2 %vm1427_vm11, %v2680_v59  ;;  %3485 = vmatmul.msk.f32.vlgmr.msrb.gmra.mxu3 %vm1427_vm11, %v2680_v59  ;;  %v2891_v63 = vmul.f32 %v2889_v40, %v4454_v21 }
 0x54a   : > { %v2892_v54 = vmul.f32 %v2890_v30, %v4456_v22  ;;  %2644 = vmatpush.msra.mxu0 %v5033_v3  ;;  %2664 = vmatpush.msra.mxu1 %v5044_v24  ;;  %v2782_v24 = vld [vmem:[#allocation16 + $0x20] sm:$0xff] }
 0x54b   : > { %2801 = vmatpush.msra.mxu2 %v4894_v42  ;;  %2821 = vmatpush.msra.mxu3 %v4897_v52 }
 0x54c   : > { %3482 = vmatmul.msk.f32.vlgmr.msra.gmra.mxu0 %vm1427_vm11, %v2572_v61  ;;  %3483 = vmatmul.msk.f32.vlgmr.msra.gmra.mxu1 %vm1427_vm11, %v2572_v61 }
 0x54d   : > { %2752 = vmatpush.msrb.mxu0 %v2732_v12  ;;  %2772 = vmatpush.msrb.mxu1 %v2733_v20  ;;  %v2831_v56 = vpop.permute.xlu1 %2830 }
 0x54e   : > { %2911 = vmatpush.msrb.mxu2 %v2891_v63  ;;  %2931 = vmatpush.msrb.mxu3 %v2892_v54  ;;  %v2829_v21 = vpop.permute.xlu0 %2828 }
 0x54f   : > { %2753 = vmatpush.msrb.mxu0 %v5052_v58  ;;  %2773 = vmatpush.msrb.mxu1 %v5058_v18  ;;  %v2832_v22 = vsel %vm1129_vm5, %v2829_v21, %v2831_v56  ;;  %v2833_v3 = vsel %vm1129_vm5, %v2831_v56, %v2829_v21  ;;  %v2735_v58 = vld [vmem:[#allocation16 + $0x18] sm:$0xff]  ;;  %v2943_v18 = vpop.permute.xlu2 %2942 }
 0x550   : > { %2912 = vmatpush.msrb.mxu2 %v5182_v57  ;;  %2932 = vmatpush.msrb.mxu3 %v5185_v28  ;;  %v2834_v29 = vmul.f32 %v2832_v22, %v4509_v48  ;;  %v2835_v47 = vmul.f32 %v2833_v3, %v4511_v49 }
 0x551   : > { %2754 = vmatpush.msrb.mxu0 %v5066_v35  ;;  %2774 = vmatpush.msrb.mxu1 %v5073_v31 }
 0x552   : > { %3488 = vmatmul.msk.f32.vlgmr.msra.gmra.mxu2 %vm1427_vm11, %v2782_v24  ;;  %3489 = vmatmul.msk.f32.vlgmr.msra.gmra.mxu3 %vm1427_vm11, %v2782_v24 }
 0x553   : > { %2913 = vmatpush.msrb.mxu2 %v5193_v15  ;;  %2933 = vmatpush.msrb.mxu3 %v5196_v16 }
 0x554   : > { %3486 = vmatmul.msk.f32.vlgmr.msrb.gmra.mxu0 %vm1427_vm11, %v2735_v58  ;;  %3487 = vmatmul.msk.f32.vlgmr.msrb.gmra.mxu1 %vm1427_vm11, %v2735_v58 }
 0x555   : > { %2854 = vmatpush.msra.mxu0 %v2834_v29  ;;  %2874 = vmatpush.msra.mxu1 %v2835_v47  ;;  %v2941_v57 = vpop.permute.xlu1 %2940 }
 0x556   : > { %v2998_v35 = vpop.permute.xlu0 %2997  ;;  %v2944_v31 = vsel %vm1266_vm7, %v2941_v57, %v2943_v18  ;;  %v2945_v28 = vsel %vm1266_vm7, %v2943_v18, %v2941_v57 }
 0x557   : > { %2855 = vmatpush.msra.mxu0 %v5115_v10  ;;  %2875 = vmatpush.msra.mxu1 %v5118_v2  ;;  %v2999_v15 = vsel %vm1330_vm8, %v2996_v55, %v2998_v35  ;;  %v3000_v16 = vsel %vm1330_vm8, %v2998_v35, %v2996_v55  ;;  %v2946_v33 = vmul.f32 %v2944_v31, %v4614_v45  ;;  %v2837_v10 = vld [vmem:[#allocation16 + $0x28] sm:$0xff]  ;;  %v3062_v35 = vstv %s3479_s8  ;;  %s3219_s8 = scalar_lea.hbm %s5567_s5, %s3512_s2 }
 0x558   : > { %v3001_v62 = vmul.f32 %v2999_v15, %v4614_v45  ;;  %v3002_v4 = vmul.f32 %v3000_v16, %v4616_v46  ;;  %v2947_v19 = vmul.f32 %v2945_v28, %v4616_v46  ;;  %v5559_v45 = vld [vmem:[#allocation32_spill] sm:$0xff]  ;;  %v5560_v46 = vld [vmem:[#allocation27_spill] sm:$0xff]  ;;  %s3222_s18 = sshll.u32 %s3219_s8, 4  ;;  %s3223_s18 = int_to_ptr.hbm [resolvable:$true] %s3222_s18 }
 0x559   : > { %2856 = vmatpush.msra.mxu0 %v5125_v14  ;;  %2876 = vmatpush.msra.mxu1 %v5128_v60  ;;  %v5563_v14 = vld [vmem:[#allocation30_spill] sm:$0xff]  ;;  %v3006_v60 = vld [vmem:[#allocation16 + $0x40] sm:$0xff]  ;;  %s3969_s14 = sshra.s32 %s3223_s18, 4  ;;  %s3970_s14 = int_to_ptr.hbm [resolvable:$true] %s3969_s14 }
 0x55a   : > { %v3003_v2 = vmul.f32 %v3001_v62, %v4509_v48  ;;  %v3004_v23 = vmul.f32 %v3002_v4, %v4511_v49  ;;  %3492 = vmatmul.msk.f32.vlgmr.msrb.gmra.mxu2 %vm1427_vm11, %v2894_v34  ;;  %3493 = vmatmul.msk.f32.vlgmr.msrb.gmra.mxu3 %vm1427_vm11, %v2894_v34  ;;  %v5561_v48 = vld [vmem:[#allocation28_spill] sm:$0xff]  ;;  %v5562_v49 = vld [vmem:[#allocation29_spill] sm:$0xff]  ;;  %v3068_v4 = vld [vmem:[#allocation18 + $0x8] sm:$0xff]  ;;  %s3971_s19 = scalar_lea.hbm %s3970_s14, 32  ;;  %p3976_p13 = scmp.lt.s32.totalorder %s3970_s14, %s5567_s5 }
 0x55b   : > { %2966 = vmatpush.msrb.mxu0 %v2946_v33  ;;  %2986 = vmatpush.msrb.mxu1 %v2947_v19  ;;  %v3067_v62 = vld [vmem:[#allocation18] sm:$0xff]  ;;  %v3074_v19 = vpop.permute.xlu2 %3073  ;;  %p3972_p1 = scmp.ne.s32.totalorder %s3970_s14, %s3971_s19  ;;  %p3977_p7 = scmp.lt.s32.totalorder %s3975_s16, %s3971_s19 }
 0x55c   : > { %3490 = vmatmul.msk.f32.vlgmr.msra.gmra.mxu0 %vm1427_vm11, %v2837_v10  ;;  %3491 = vmatmul.msk.f32.vlgmr.msra.gmra.mxu1 %vm1427_vm11, %v2837_v10 }
 0x55d   : > { %2967 = vmatpush.msrb.mxu0 %v5558_v6  ;;  %2987 = vmatpush.msrb.mxu1 %v5559_v45  ;;  %v3079_v10 = vpop.permute.xlu1 %3078  ;;  %p3973_p3 = pnand %p3972_p1, %p4293_p0  ;;  %p3978_p8 = por %p3977_p7, %p3976_p13 }
 0x55e   : > { %3023 = vmatpush.msra.mxu2 %v3003_v2  ;;  %3043 = vmatpush.msra.mxu3 %v3004_v23  ;;  %v3056_v57 = vpop.permute.xlu0 %3055 }
 0x55f   : > { %2968 = vmatpush.msrb.mxu0 %v5560_v46  ;;  %2988 = vmatpush.msrb.mxu1 %v5561_v48  ;;  %p3974_p4 = pneg %p3973_p3 }
 0x560   : > { %3024 = vmatpush.msra.mxu2 %v5562_v49  ;;  %3044 = vmatpush.msra.mxu3 %v5563_v14 }
 0x561   : > { %p3979_p9 = pnand %p3978_p8, %p3974_p4 }
 0x562   : > { %3025 = vmatpush.msra.mxu2 %v5564_v25  ;;  %3045 = vmatpush.msra.mxu3 %v5565_v39  ;;  %v3137_v25 = vld [vmem:[%s5566_s25] sm:$0xff]  ;;  %v3138_v39 = vld [vmem:[%s5566_s25 + $0x8] sm:$0xff] }
 0x563   : > { %3496 = vmatmul.msk.f32.vlgmr.msra.gmra.mxu2 %vm1427_vm11, %v3006_v60  ;;  %3497 = vmatmul.msk.f32.vlgmr.msra.gmra.mxu3 %vm1427_vm11, %v3006_v60 }
 0x564   : > { %3494 = vmatmul.msk.f32.vlgmr.msrb.gmra.mxu0 %vm1427_vm11, %v2949_v11  ;;  %3495 = vmatmul.msk.f32.vlgmr.msrb.gmra.mxu1 %vm1427_vm11, %v2949_v11 }
 0x5c2   : > { %v2603_v13 = vpop.f32.mrf.mxu2  ;;  %v2623_v43 = vpop.f32.mrf.mxu3 }
 0x5c9   : > { %v2646_v44 = vpop.f32.mrf.mxu0  ;;  %v2666_v41 = vpop.f32.mrf.mxu1 }
 0x5ca   : > { %v2647_v8 = vadd.f32 %v2646_v44, %v2603_v13  ;;  %v2667_v9 = vadd.f32 %v2666_v41, %v2623_v43 }
 0x5cc   : > { %v2701_v0 = vpop.f32.mrf.mxu2  ;;  %v2721_v26 = vpop.f32.mrf.mxu3 }
 0x5cd   : > { %v2724_v59 = vadd.f32 %v2701_v0, %v2647_v8  ;;  %v2725_v36 = vadd.f32 %v2721_v26, %v2667_v9 }
 0x5d1   : > { %v2756_v38 = vpop.f32.mrf.mxu0  ;;  %v2776_v1 = vpop.f32.mrf.mxu1 }
 0x5d2   : > { %v2779_v37 = vadd.f32 %v2756_v38, %v2724_v59  ;;  %v2780_v40 = vadd.f32 %v2776_v1, %v2725_v36 }
 0x5d5   : > { %v2803_v5 = vpop.f32.mrf.mxu2  ;;  %v2823_v7 = vpop.f32.mrf.mxu3 }
 0x5d6   : > { %v2826_v20 = vadd.f32 %v2803_v5, %v2779_v37  ;;  %v2827_v61 = vadd.f32 %v2823_v7, %v2780_v40 }
 0x5d9   : > { %v2858_v53 = vpop.f32.mrf.mxu0  ;;  %v2878_v27 = vpop.f32.mrf.mxu1 }
 0x5da   : > { %v2881_v63 = vadd.f32 %v2858_v53, %v2826_v20  ;;  %v2882_v54 = vadd.f32 %v2878_v27, %v2827_v61 }
 0x5dd   : > { %v2915_v30 = vpop.f32.mrf.mxu2  ;;  %v2935_v12 = vpop.f32.mrf.mxu3 }
 0x5de   : > { %v2938_v21 = vadd.f32 %v2915_v30, %v2881_v63  ;;  %v2939_v22 = vadd.f32 %v2935_v12, %v2882_v54 }
 0x5e1   : > { %v2970_v55 = vpop.f32.mrf.mxu0  ;;  %v2990_v56 = vpop.f32.mrf.mxu1 }
 0x5e2   : > { %v2993_v3 = vadd.f32 %v2970_v55, %v2938_v21  ;;  %v2994_v24 = vadd.f32 %v2990_v56, %v2939_v22 }
 0x5e6   : > { %v3027_v29 = vpop.f32.mrf.mxu2  ;;  %v3047_v47 = vpop.f32.mrf.mxu3 }
 0x5e7   : > { %v3050_v58 = vadd.f32 %v3027_v29, %v2993_v3  ;;  %v3051_v18 = vadd.f32 %v3047_v47, %v2994_v24 }
 0x5e9   : > { %v3058_v31 = vadd.f32 %v3056_v57, %v3050_v58  ;;  %v3059_v28 = vadd.f32 %v3056_v57, %v3051_v18 }
 0x5eb   : > { %v3063_v15 = vmul.f32 %v3062_v35, %v3058_v31  ;;  %v3064_v16 = vmul.f32 %v3062_v35, %v3059_v28  ;;  %vm3060_vm0 = vcmp.ge.f32.partialorder %v3058_v31, 0.0  ;;  %vm3061_vm1 = vcmp.ge.f32.partialorder %v3059_v28, 0.0 }
 0x5ed   : > { %v3065_v33 = vsel %vm3060_vm0, %v3058_v31, %v3063_v15  ;;  %v3066_v34 = vsel %vm3061_vm1, %v3059_v28, %v3064_v16 }
 0x5ee   : > { %3099 = vmatpush.msra.mxu0 %v3065_v33  ;;  %3122 = vmatpush.msra.mxu1 %v3066_v34 }
 0x5f0   : > { %3100 = vmatpush.msra.mxu0 %v5234_v51  ;;  %3123 = vmatpush.msra.mxu1 %v5236_v32 }
 0x5f2   : > { %3101 = vmatpush.msra.mxu0 %v4924_v50  ;;  %3124 = vmatpush.msra.mxu1 %v4933_v17 }
 0x5f4   : > { %3102 = vmatpush.msra.mxu0 %v4894_v42  ;;  %3125 = vmatpush.msra.mxu1 %v4897_v52 }
 0x5f5   : > { %3498 = vmatmul.msk.f32.vlgmr.msra.gmra.mxu0 %vm1926_vm14, %v3067_v62  ;;  %3500 = vmatmul.msk.f32.vlgmr.msra.gmra.mxu1 %vm1926_vm14, %v3067_v62 }
 0x5fd   : > { %3499 = vmatmul.msk.f32.gmra.mxu0 %vm1926_vm14, %v3068_v4  ;;  %3501 = vmatmul.msk.f32.gmra.mxu1 %vm1926_vm14, %v3068_v4 }
 0x672   : > { %v3104_v51 = vpop.f32.mrf.mxu0  ;;  %v3127_v32 = vpop.f32.mrf.mxu1 }
 0x673   : > { %v3105_v6 = vadd.f32 %v3104_v51, %v3074_v19  ;;  %v3128_v45 = vadd.f32 %v3127_v32, %v3074_v19 }
 0x675   : > { %v3133_v60 = vadd.f32 %v3105_v6, %v4894_v42  ;;  %v3134_v11 = vadd.f32 %v3128_v45, %v4897_v52 }
 0x67a   : > { %v3107_v2 = vpop.f32.mrf.mxu0  ;;  %v3130_v23 = vpop.f32.mrf.mxu1 }
 0x67b   : > { %v3108_v46 = vadd.f32 %v3107_v2, %v3079_v10  ;;  %v3131_v48 = vadd.f32 %v3130_v23, %v3079_v10 }
 0x67d   : > { %v3135_v49 = vadd.f32 %v3108_v46, %v4924_v50  ;;  %v3136_v14 = vadd.f32 %v3131_v48, %v4933_v17 }
 0x67f   : > { %3169 = vmatpush.msrb.mxu2 %v3135_v49  ;;  %3192 = vmatpush.msrb.mxu3 %v3136_v14 }
 0x681   : > { %3170 = vmatpush.msrb.mxu2 %v3133_v60  ;;  %3193 = vmatpush.msrb.mxu3 %v3134_v11 }
 0x683   : > { %3171 = vmatpush.msrb.mxu2 %v4924_v50  ;;  %3194 = vmatpush.msrb.mxu3 %v4933_v17  ;;  %v3144_v50 = vpop.permute.xlu0 %3143 }
 0x685   : > { %3172 = vmatpush.msrb.mxu2 %v4894_v42  ;;  %3195 = vmatpush.msrb.mxu3 %v4897_v52  ;;  %v3149_v42 = vpop.permute.xlu1 %3148 }
 0x686   : > { %3502 = vmatmul.msk.f32.vlgmr.msrb.gmra.mxu2 %vm1926_vm14, %v3137_v25  ;;  %3504 = vmatmul.msk.f32.vlgmr.msrb.gmra.mxu3 %vm1926_vm14, %v3137_v25 }
 0x68e   : > { %3503 = vmatmul.msk.f32.gmra.mxu2 %vm1926_vm14, %v3138_v39  ;;  %3505 = vmatmul.msk.f32.gmra.mxu3 %vm1926_vm14, %v3138_v39 }
 0x709   : > { %v3174_v17 = vpop.f32.mrf.mxu2  ;;  %v3197_v13 = vpop.f32.mrf.mxu3 }
 0x70a   : > { %v3175_v43 = vadd.f32 %v3174_v17, %v3144_v50  ;;  %v3198_v44 = vadd.f32 %v3197_v13, %v3144_v50 }
 0x70c   : > { %3203 = vst [vmem:[%s787_s29] sm:$0xff] %v3175_v43 }
 0x70d   : > { %3204 = vst [vmem:[%s787_s29 + $0x8] sm:$0xff] %v3198_v44 }
 0x711   : > { %v3177_v52 = vpop.f32.mrf.mxu2  ;;  %v3200_v41 = vpop.f32.mrf.mxu3 }
 0x712   : > { %v3178_v0 = vadd.f32 %v3177_v52, %v3149_v42  ;;  %v3201_v26 = vadd.f32 %v3200_v41, %v3149_v42 }
 0x714   : > { %3205 = vst [vmem:[%s787_s29 + $0x10] sm:$0xff] %v3178_v0 }
 0x715   : > { %3206 = vst [vmem:[%s787_s29 + $0x18] sm:$0xff] %v3201_v26 }
 0x716   : > { %3982 = shalt.err (!%p3979_p9)
}
 0x717   : > { %s4065_s30 = smov 256  }
 0x718   : > { %3551 = dma.vmem_to_hbm [thread:$0]  (%p4293_p0), %s3221_s28, 512, %s3223_s18, %s3208_s27, %s4065_s30, %s4065_s30, %s4057_s12  }
 0x719 PF: > { %s3237_s29 = sand.u32 1, %s4029_s1   ;;  %p5568_p10 = scmp.ge.s32.totalorder %s4041_s24, 2 }
 0x71a   : > { %s3238_s26 = scalar_lea.sflag [#allocation4], %s3237_s29 }
 0x71b   : > { %p3586_p11 = pnand %p5568_p10, %p4299_p6 }
 0x71d   : > { %p3587_p12 = pneg %p3586_p11 }
 0x71f   : > { %4024 = dma.done.wait (%p3587_p12), %s3238_s26, 512  }
 0x720   : > { %4026 = vsyncadd (%p3587_p12), %s3238_s26, 4294966784  ;;  %p38_p2 = scmp.ge.s32.totalorder %s4269_s17, 4   ;;  %s5569_s1 = smov %s4033_s22 }
 0x721   : > { %s5570_s22 = smov %s4037_s23  ;;  %s5571_s23 = smov %s4281_s15 }
 0x722   : > { %s5572_s24 = smov %s4269_s17  ;;  %40 = sbr.rel (!%p38_p2) target bundleno = 27 (0x1b), region = 214 }
 0x727   :  { %3244 = vsyncpa [#allocation3], 1 }
 0x728   :  { %3246 = vsyncpa [#allocation3 + $0x1], 1 }
 0x729   :  { %3247 = vsyncpa [#allocation8], 1 }
 0x72a   :  { %3248 = vsyncpa [#allocation11], 1 }
 0x72b   :  { %3249 = vsyncpa [#allocation14], 1 }
 0x72c   :  { %3250 = vsyncpa [#allocation17], 1 }
 0x72d   :  { %3251 = vsyncpa [#allocation4], 1 }
 0x72e   :  { %3253 = vsyncpa [#allocation4 + $0x1], 1 }
 0x72f   :  { %3254 = vsyncpa [#allocation5], 1 }
 0x730   :  { %3256 = vsyncpa [#allocation5 + $0x1], 1 }

</bundles_post_ra>
